<compile_context>
chip_gen: v5e
topology: v5e:2x2
jax: 0.10.0
libtpu: 0.0.40
codegen_flags: <defaults>
</compile_context>

<pallas_src>
import math
import functools

import jax
import jax.numpy as jnp
import numpy as np
from jax.experimental import pallas as pl
from jax.experimental.pallas import tpu as pltpu


# ----------------------------------------------------------------------------
# Glue: exact replicas of the PyTorch helper reshapes (including the
# permute(0,1,3,2).contiguous().view(-1, ws, C) "scramble").
# ----------------------------------------------------------------------------
def window_partition(x, window_size):
    B, H, C = x.shape
    x = x.reshape(B, H // window_size, window_size, C)
    x = jnp.transpose(x, (0, 1, 3, 2))          # (B, nW, C, ws) -- contiguous
    return x.reshape(-1, window_size, C)        # reinterpret as (B*nW, ws, C)


def window_reverse(windows, window_size, H):
    B = windows.shape[0] // (H // window_size)
    x = windows.reshape(B, H // window_size, window_size, -1)
    x = jnp.transpose(x, (0, 1, 3, 2))
    return x.reshape(B, H, -1)


def calculate_mask(H, window_size, shift_size):
    img_mask = np.zeros((1, H, 1), np.float32)
    h_slices = (slice(0, -window_size),
                slice(-window_size, -shift_size),
                slice(-shift_size, None))
    cnt = 0
    for h in h_slices:
        img_mask[:, h, :] = cnt
        cnt += 1
    mw = window_partition(jnp.asarray(img_mask), window_size)
    mw = mw.reshape(-1, window_size)
    attn_mask = mw[:, None, :] - mw[:, :, None]           # (nW, ws, ws)
    attn_mask = jnp.where(attn_mask != 0, jnp.float32(-100.0), jnp.float32(0.0))
    return attn_mask


def relative_position_bias(table, window_size, num_heads):
    coords = jnp.arange(window_size)
    rel = coords[:, None] - coords[None, :]                # i - j, in [-(ws-1), ws-1]
    idx = jnp.mod(rel, 2 * window_size - 1)                # python-style negative wrap
    bias = table[idx.reshape(-1)].reshape(window_size, window_size, num_heads)
    return jnp.transpose(bias, (2, 0, 1))                  # (nh, ws, ws)


# ----------------------------------------------------------------------------
# Parameter preparation (done once, not per forward call)
# ----------------------------------------------------------------------------
def prepare_params(params, *, dim, input_resolution, num_heads, window_size,
                   shift_size):
    ws, ss = window_size, shift_size
    if input_resolution <= ws:                   # mirrors __init__ adjustment
        ss = 0
        ws = input_resolution
    assert 0 <= ss < ws, "shift_size must be in [0, window_size)"
    C = dim
    assert C % num_heads == 0
    # Fused scrambled-layout LayerNorm requires window_size | dim so that the
    # token index of a scrambled element depends only on its lane position.
    # TODO(synk): fall back to a separate LN1 kernel when C % ws != 0.
    assert C % ws == 0, "fused norm1 requires window_size to divide dim"

    hd = C // num_heads
    scale = hd ** (-0.5)

    # Fold qk scale into the q columns of Wqkv / bqkv (review item).
    col_scale = jnp.concatenate([jnp.full((C,), scale, jnp.float32),
                                 jnp.ones((2 * C,), jnp.float32)])
    wqkv = params["wqkv"] * col_scale[None, :]
    bqkv = params["bqkv"] * col_scale

    # norm1 gamma/beta mapped into the scrambled window layout:
    # gamma_s[i, j] = gamma[i*(C//ws) + j//ws]  (computed via the same scramble)
    ln1_g_s = window_partition(jnp.broadcast_to(params["ln1_g"], (1, ws, C)), ws)[0]
    ln1_b_s = window_partition(jnp.broadcast_to(params["ln1_b"], (1, ws, C)), ws)[0]

    rpb_bias = relative_position_bias(params["rpb_table"], ws, num_heads)  # (nh, ws, ws)
    attn_mask = calculate_mask(input_resolution, ws, ss) if ss > 0 else None

    prep = dict(params)
    prep.update(
        wqkv=wqkv, bqkv=bqkv,
        ln1_g_s=ln1_g_s, ln1_b_s=ln1_b_s,
        rpb_bias=rpb_bias, attn_mask=attn_mask,
        window_size=ws, shift_size=ss, num_heads=num_heads,
        input_resolution=input_resolution,
    )
    return prep


# ----------------------------------------------------------------------------
# Kernel 1: fused norm1 + windowed multi-head self-attention
#   x_ref holds the RAW (un-normalized) rolled input, already window-partitioned
#   ("scrambled").  LayerNorm statistics are computed directly in that layout:
#   the token of scrambled element (i, j) is j % ws, its channel is
#   i*(C//ws) + j//ws, so per-token sums are a sublane reduction plus a few
#   static lane-slice adds.
# ----------------------------------------------------------------------------
def window_attention_kernel(x_ref, ln_g_ref, ln_b_ref, wqkv_ref, bqkv_ref,
                            wproj_ref, bproj_ref, bias_ref, *rest,
                            num_heads, has_mask, eps=1e-5):
    mask_ref = rest[0] if has_mask else None
    o_ref = rest[-1]

    xs = x_ref[...].astype(jnp.float32)            # (W, N, C) scrambled raw windows
    W, N, C = xs.shape
    grp = C // N                                   # channels-per-token group count
    hd = C // num_heads

    # ---- norm1 in scrambled layout -----------------------------------------
    colsum = jnp.sum(xs, axis=1, keepdims=True)        # (W, 1, C)
    colsq = jnp.sum(xs * xs, axis=1, keepdims=True)    # (W, 1, C)
    tok_sum = colsum[:, :, 0:N]
    tok_sq = colsq[:, :, 0:N]
    for m in range(1, grp):
        tok_sum = tok_sum + colsum[:, :, m * N:(m + 1) * N]
        tok_sq = tok_sq + colsq[:, :, m * N:(m + 1) * N]
    mean = tok_sum * (1.0 / C)                         # (W, 1, N) per-token mean
    var = tok_sq * (1.0 / C) - mean * mean
    inv = jax.lax.rsqrt(var + eps)
    mean_l = jnp.concatenate([mean] * grp, axis=-1)    # (W, 1, C), period-N pattern
    inv_l = jnp.concatenate([inv] * grp, axis=-1)
    xn = (xs - mean_l) * inv_l * ln_g_ref[...] + ln_b_ref[...]   # (W, N, C)

    # ---- qkv projection (one big matmul for all windows) -------------------
    xn2 = xn.reshape(W * N, C)
    qkv = jnp.dot(xn2, wqkv_ref[...], preferred_element_type=jnp.float32)
    qkv = qkv + bqkv_ref[...]                          # (W*N, 3C); qk scale pre-folded

    wproj = wproj_ref[...]                             # (C, C), loaded once

    # ---- per-head attention, windows batched in the einsum ------------------
    y = None
    for h in range(num_heads):
        q = qkv[:, h * hd:(h + 1) * hd].reshape(W, N, hd)
        k = qkv[:, C + h * hd:C + (h + 1) * hd].reshape(W, N, hd)
        v = qkv[:, 2 * C + h * hd:2 * C + (h + 1) * hd].reshape(W, N, hd)

        s = jnp.einsum('bnd,bmd->bnm', q, k,
                       preferred_element_type=jnp.float32)       # (W, N, N)
        s = s + bias_ref[h]
        if has_mask:
            s = s + mask_ref[...]
        s = s - jnp.max(s, axis=-1, keepdims=True)
        p = jnp.exp(s)
        p = p * pl.reciprocal(jnp.sum(p, axis=-1, keepdims=True), approx=True)

        oh = jnp.einsum('bnm,bmd->bnd', p, v,
                        preferred_element_type=jnp.float32).reshape(W * N, hd)
        # Accumulate the output projection per head instead of concatenating
        # head outputs along lanes.
        contrib = jnp.dot(oh, wproj[h * hd:(h + 1) * hd, :],
                          preferred_element_type=jnp.float32)
        y = contrib if y is None else y + contrib

    y = y + bproj_ref[...]
    o_ref[...] = y.reshape(W, N, C).astype(o_ref.dtype)


def window_attention_fused(x_windows, prep, mask, *, win_tile=None):
    Bw, N, C = x_windows.shape
    nh = prep["num_heads"]
    if win_tile is None or Bw % win_tile != 0:
        win_tile = Bw          # all windows in one grid step at small sizes
        # TODO(synk): for large Bw pick a VMEM-sized window tile (v7x: 64 MiB).
    has_mask = mask is not None

    kern = functools.partial(window_attention_kernel,
                             num_heads=nh, has_mask=has_mask)

    in_specs = [
        pl.BlockSpec((win_tile, N, C), lambda i: (i, 0, 0)),   # raw windows
        pl.BlockSpec((N, C), lambda i: (0, 0)),                # scrambled gamma
        pl.BlockSpec((N, C), lambda i: (0, 0)),                # scrambled beta
        pl.BlockSpec((C, 3 * C), lambda i: (0, 0)),            # wqkv (scaled)
        pl.BlockSpec((1, 3 * C), lambda i: (0, 0)),            # bqkv (scaled)
        pl.BlockSpec((C, C), lambda i: (0, 0)),                # wproj
        pl.BlockSpec((1, C), lambda i: (0, 0)),                # bproj
        pl.BlockSpec((nh, N, N), lambda i: (0, 0, 0)),         # rel-pos bias
    ]
    args = [x_windows, prep["ln1_g_s"], prep["ln1_b_s"],
            prep["wqkv"], prep["bqkv"].reshape(1, -1),
            prep["wproj"], prep["bproj"].reshape(1, -1),
            prep["rpb_bias"]]
    if has_mask:
        in_specs.append(pl.BlockSpec((win_tile, N, N), lambda i: (i, 0, 0)))
        args.append(mask)

    return pl.pallas_call(
        kern,
        out_shape=jax.ShapeDtypeStruct((Bw, N, C), x_windows.dtype),
        grid=(Bw // win_tile,),
        in_specs=in_specs,
        out_specs=pl.BlockSpec((win_tile, N, C), lambda i: (i, 0, 0)),
        compiler_params=pltpu.CompilerParams(dimension_semantics=("parallel",)),
    )(*args)


# ----------------------------------------------------------------------------
# Kernel 2: fused shortcut add + norm2 + fc1 + GELU + fc2 + residual
# ----------------------------------------------------------------------------
def mlp_residual_kernel(short_ref, attn_ref, g_ref, b_ref, w1_ref, b1_ref,
                        w2_ref, b2_ref, o_ref, *, eps=1e-5):
    x = short_ref[...].astype(jnp.float32) + attn_ref[...].astype(jnp.float32)
    mean = jnp.mean(x, axis=-1, keepdims=True)
    var = jnp.mean((x - mean) ** 2, axis=-1, keepdims=True)
    xn = (x - mean) * jax.lax.rsqrt(var + eps)
    xn = xn * g_ref[...] + b_ref[...]
    h = jnp.dot(xn, w1_ref[...], preferred_element_type=jnp.float32) + b1_ref[...]
    # exact GELU (PyTorch nn.GELU default): 0.5*x*(1+erf(x/sqrt(2)))
    h = 0.5 * h * (1.0 + jax.lax.erf(h * np.float32(1.0 / math.sqrt(2.0))))
    y = jnp.dot(h, w2_ref[...], preferred_element_type=jnp.float32) + b2_ref[...]
    o_ref[...] = (x + y).astype(o_ref.dtype)


def mlp_residual(shortcut2d, attn2d, prep, *, block_rows=None):
    M, C = shortcut2d.shape
    Hd = prep["w1"].shape[1]
    if block_rows is None or M % block_rows != 0:
        # One step at small sizes; tile rows across grid steps (and TCs) at scale.
        block_rows = M if (M <= 1024 or M % 512 != 0) else 512
        # TODO(synk): on v7x (64 MiB VMEM) derive block_rows from a VMEM budget.
    return pl.pallas_call(
        mlp_residual_kernel,
        out_shape=jax.ShapeDtypeStruct((M, C), shortcut2d.dtype),
        grid=(M // block_rows,),
        in_specs=[
            pl.BlockSpec((block_rows, C), lambda i: (i, 0)),
            pl.BlockSpec((block_rows, C), lambda i: (i, 0)),
            pl.BlockSpec((1, C), lambda i: (0, 0)),
            pl.BlockSpec((1, C), lambda i: (0, 0)),
            pl.BlockSpec((C, Hd), lambda i: (0, 0)),
            pl.BlockSpec((1, Hd), lambda i: (0, 0)),
            pl.BlockSpec((Hd, C), lambda i: (0, 0)),
            pl.BlockSpec((1, C), lambda i: (0, 0)),
        ],
        out_specs=pl.BlockSpec((block_rows, C), lambda i: (i, 0)),
        compiler_params=pltpu.CompilerParams(dimension_semantics=("parallel",)),
    )(shortcut2d, attn2d,
      prep["ln2_g"].reshape(1, C), prep["ln2_b"].reshape(1, C),
      prep["w1"], prep["b1"].reshape(1, Hd),
      prep["w2"], prep["b2"].reshape(1, C))


# ----------------------------------------------------------------------------
# Full SwinTransformerBlock forward
# ----------------------------------------------------------------------------
def swin_block_forward(x, x_size, prep):
    B, L, C = x.shape
    H = x_size
    ws = prep["window_size"]
    ss = prep["shift_size"]
    nW = H // ws

    shortcut = x
    x3 = x.reshape(B, H, C)

    # norm1 commutes with the roll (both per-token); roll the RAW input and do
    # the LayerNorm inside the attention kernel in scrambled layout.
    shifted = jnp.roll(x3, -ss, axis=1) if ss > 0 else x3
    x_windows = window_partition(shifted, ws)              # (B*nW, ws, C) raw

    if ss > 0:
        if H == prep["input_resolution"]:
            mask_nw = prep["attn_mask"]
        else:
            mask_nw = calculate_mask(H, ws, ss)
        Bw = x_windows.shape[0]
        mask = jnp.broadcast_to(mask_nw[None], (B, nW, ws, ws)).reshape(Bw, ws, ws)
    else:
        mask = None                                          # mask-free kernel variant

    attn_windows = window_attention_fused(x_windows, prep, mask)   # (B*nW, ws, C)

    shifted_o = window_reverse(attn_windows, ws, H)          # (B, H, C)
    xa = jnp.roll(shifted_o, ss, axis=1) if ss > 0 else shifted_o

    out = mlp_residual(shortcut.reshape(B * L, C), xa.reshape(B * L, C), prep)
    return out.reshape(B, L, C)


# ----------------------------------------------------------------------------
# Pure-JAX reference (mirrors the PyTorch code op-for-op) for validation
# ----------------------------------------------------------------------------
def _ln_ref(x, g, b, eps=1e-5):
    mean = x.mean(-1, keepdims=True)
    var = ((x - mean) ** 2).mean(-1, keepdims=True)
    return (x - mean) / jnp.sqrt(var + eps) * g + b


def _attn_ref(xw, params, bias, mask, num_heads):
    B_, N, C = xw.shape
    hd = C // num_heads
    qkv = xw @ params["wqkv"] + params["bqkv"]
    qkv = qkv.reshape(B_, N, 3, num_heads, hd).transpose(2, 0, 3, 1, 4)
    q, k, v = qkv[0], qkv[1], qkv[2]
    q = q * (hd ** -0.5)
    attn = q @ jnp.swapaxes(k, -2, -1)
    attn = attn + bias[None]
    if mask is not None:
        nW = mask.shape[0]
        attn = attn.reshape(B_ // nW, nW, num_heads, N, N) + mask[None, :, None]
        attn = attn.reshape(-1, num_heads, N, N)
    attn = jax.nn.softmax(attn, axis=-1)
    out = jnp.swapaxes(attn @ v, 1, 2).reshape(B_, N, C)
    return out @ params["wproj"] + params["bproj"]


def reference_forward(x, x_size, params, *, num_heads, window_size, shift_size,
                      input_resolution):
    B, L, C = x.shape
    H = x_size
    if input_resolution <= window_size:
        shift_size = 0
        window_size = input_resolution
    shortcut = x
    xn = _ln_ref(x, params["ln1_g"], params["ln1_b"]).reshape(B, H, C)
    shifted_x = jnp.roll(xn, -shift_size, axis=1) if shift_size > 0 else xn
    x_windows = window_partition(shifted_x, window_size)
    mask = calculate_mask(H, window_size, shift_size) if shift_size > 0 else None
    bias = relative_position_bias(params["rpb_table"], window_size, num_heads)
    attn_windows = _attn_ref(x_windows, params, bias, mask, num_heads)
    shifted_x = window_reverse(attn_windows, window_size, H)
    xa = jnp.roll(shifted_x, shift_size, axis=1) if shift_size > 0 else shifted_x
    xr = shortcut + xa.reshape(B, H, C)
    h = _ln_ref(xr, params["ln2_g"], params["ln2_b"])
    h = h @ params["w1"] + params["b1"]
    h = jax.nn.gelu(h, approximate=False)
    h = h @ params["w2"] + params["b2"]
    return xr + h


# ----------------------------------------------------------------------------
# Main
# ----------------------------------------------------------------------------
if __name__ == "__main__":
    # SwinTransformerBlock(dim=32, input_resolution=16, num_heads=4,
    #                      window_size=8, shift_size=4, mlp_ratio=4.0)
    B, L, C = 2, 16, 32
    num_heads = 4
    window_size = 8
    shift_size = 4
    mlp_ratio = 4.0
    input_resolution = 16
    x_size = 16
    hidden = int(C * mlp_ratio)

    key = jax.random.PRNGKey(0)
    ks = jax.random.split(key, 10)
    params = {
        "ln1_g": jnp.ones((C,), jnp.float32),
        "ln1_b": jnp.zeros((C,), jnp.float32),
        "ln2_g": jnp.ones((C,), jnp.float32),
        "ln2_b": jnp.zeros((C,), jnp.float32),
        "wqkv": 0.05 * jax.random.normal(ks[0], (C, 3 * C), jnp.float32),
        "bqkv": 0.05 * jax.random.normal(ks[1], (3 * C,), jnp.float32),
        "wproj": 0.05 * jax.random.normal(ks[2], (C, C), jnp.float32),
        "bproj": 0.05 * jax.random.normal(ks[3], (C,), jnp.float32),
        "rpb_table": 0.02 * jax.random.normal(ks[4], (2 * window_size - 1, num_heads),
                                              jnp.float32),
        "w1": 0.05 * jax.random.normal(ks[5], (C, hidden), jnp.float32),
        "b1": 0.05 * jax.random.normal(ks[6], (hidden,), jnp.float32),
        "w2": 0.05 * jax.random.normal(ks[7], (hidden, C), jnp.float32),
        "b2": 0.05 * jax.random.normal(ks[8], (C,), jnp.float32),
    }

    x = jax.random.normal(ks[9], (B, L, C), jnp.float32)

    prep = prepare_params(params, dim=C, input_resolution=input_resolution,
                          num_heads=num_heads, window_size=window_size,
                          shift_size=shift_size)

    out = swin_block_forward(x, x_size, prep)
    out = jax.block_until_ready(out)

    ref = reference_forward(
        x, x_size, params,
        num_heads=num_heads, window_size=window_size, shift_size=shift_size,
        input_resolution=input_resolution)
    ref = jax.block_until_ready(ref)

    np.testing.assert_allclose(np.asarray(out), np.asarray(ref),
                               atol=2e-3, rtol=2e-3)
    print("KERNEL_OK")
</pallas_src>

<mosaic_0001>
module attributes {stable_mosaic.version = 11 : i64} {
  func.func @window_attention_kernel(%arg0: i32, %arg1: memref<4x8x32xf32, #tpu.memory_space<vmem>>, %arg2: memref<8x32xf32, #tpu.memory_space<vmem>>, %arg3: memref<8x32xf32, #tpu.memory_space<vmem>>, %arg4: memref<32x96xf32, #tpu.memory_space<vmem>>, %arg5: memref<1x96xf32, #tpu.memory_space<vmem>>, %arg6: memref<32x32xf32, #tpu.memory_space<vmem>>, %arg7: memref<1x32xf32, #tpu.memory_space<vmem>>, %arg8: memref<4x8x8xf32, #tpu.memory_space<vmem>>, %arg9: memref<4x8x8xf32, #tpu.memory_space<vmem>>, %arg10: memref<4x8x32xf32, #tpu.memory_space<vmem>>) attributes {dimension_semantics = [#tpu.dimension_semantics<parallel>], iteration_bounds = array<i64: 1>, scalar_prefetch = 0 : i64, scratch_operands = 0 : i64, tpu.core_type = #tpu.core_type<tc>, window_params = [{transform_indices = @transform_0, window_bounds = array<i64: 4, 8, 32>}, {pipeline_mode = #tpu.pipeline_mode<synchronous>, transform_indices = @transform_1, window_bounds = array<i64: 8, 32>}, {pipeline_mode = #tpu.pipeline_mode<synchronous>, transform_indices = @transform_2, window_bounds = array<i64: 8, 32>}, {pipeline_mode = #tpu.pipeline_mode<synchronous>, transform_indices = @transform_3, window_bounds = array<i64: 32, 96>}, {pipeline_mode = #tpu.pipeline_mode<synchronous>, transform_indices = @transform_4, window_bounds = array<i64: 1, 96>}, {pipeline_mode = #tpu.pipeline_mode<synchronous>, transform_indices = @transform_5, window_bounds = array<i64: 32, 32>}, {pipeline_mode = #tpu.pipeline_mode<synchronous>, transform_indices = @transform_6, window_bounds = array<i64: 1, 32>}, {pipeline_mode = #tpu.pipeline_mode<synchronous>, transform_indices = @transform_7, window_bounds = array<i64: 4, 8, 8>}, {transform_indices = @transform_8, window_bounds = array<i64: 4, 8, 8>}, {transform_indices = @transform_9, window_bounds = array<i64: 4, 8, 32>}]} {
    %c0 = arith.constant 0 : index
    %c0_0 = arith.constant 0 : index
    %c0_1 = arith.constant 0 : index
    %0 = vector.load %arg1[%c0, %c0_0, %c0_1] : memref<4x8x32xf32, #tpu.memory_space<vmem>>, vector<4x8x32xf32>
    %cst = arith.constant dense<0.000000e+00> : vector<4x32xf32>
    %1 = vector.multi_reduction <add>, %0, %cst [1] : vector<4x8x32xf32> to vector<4x32xf32>
    %2 = vector.shape_cast %1 : vector<4x32xf32> to vector<4x1x32xf32>
    %3 = arith.mulf %0, %0 : vector<4x8x32xf32>
    %cst_2 = arith.constant dense<0.000000e+00> : vector<4x32xf32>
    %4 = vector.multi_reduction <add>, %3, %cst_2 [1] : vector<4x8x32xf32> to vector<4x32xf32>
    %5 = vector.shape_cast %4 : vector<4x32xf32> to vector<4x1x32xf32>
    %6 = vector.extract_strided_slice %2 {offsets = [0, 0, 0], sizes = [4, 1, 8], strides = [1, 1, 1]} : vector<4x1x32xf32> to vector<4x1x8xf32>
    %7 = vector.extract_strided_slice %5 {offsets = [0, 0, 0], sizes = [4, 1, 8], strides = [1, 1, 1]} : vector<4x1x32xf32> to vector<4x1x8xf32>
    %8 = vector.extract_strided_slice %2 {offsets = [0, 0, 8], sizes = [4, 1, 8], strides = [1, 1, 1]} : vector<4x1x32xf32> to vector<4x1x8xf32>
    %9 = arith.addf %6, %8 : vector<4x1x8xf32>
    %10 = vector.extract_strided_slice %5 {offsets = [0, 0, 8], sizes = [4, 1, 8], strides = [1, 1, 1]} : vector<4x1x32xf32> to vector<4x1x8xf32>
    %11 = arith.addf %7, %10 : vector<4x1x8xf32>
    %12 = vector.extract_strided_slice %2 {offsets = [0, 0, 16], sizes = [4, 1, 8], strides = [1, 1, 1]} : vector<4x1x32xf32> to vector<4x1x8xf32>
    %13 = arith.addf %9, %12 : vector<4x1x8xf32>
    %14 = vector.extract_strided_slice %5 {offsets = [0, 0, 16], sizes = [4, 1, 8], strides = [1, 1, 1]} : vector<4x1x32xf32> to vector<4x1x8xf32>
    %15 = arith.addf %11, %14 : vector<4x1x8xf32>
    %16 = vector.extract_strided_slice %2 {offsets = [0, 0, 24], sizes = [4, 1, 8], strides = [1, 1, 1]} : vector<4x1x32xf32> to vector<4x1x8xf32>
    %17 = arith.addf %13, %16 : vector<4x1x8xf32>
    %18 = vector.extract_strided_slice %5 {offsets = [0, 0, 24], sizes = [4, 1, 8], strides = [1, 1, 1]} : vector<4x1x32xf32> to vector<4x1x8xf32>
    %19 = arith.addf %15, %18 : vector<4x1x8xf32>
    %cst_3 = arith.constant 3.125000e-02 : f32
    %20 = vector.broadcast %cst_3 : f32 to vector<4x1x8xf32>
    %21 = arith.mulf %17, %20 : vector<4x1x8xf32>
    %cst_4 = arith.constant 3.125000e-02 : f32
    %22 = vector.broadcast %cst_4 : f32 to vector<4x1x8xf32>
    %23 = arith.mulf %19, %22 : vector<4x1x8xf32>
    %24 = arith.mulf %21, %21 : vector<4x1x8xf32>
    %25 = arith.subf %23, %24 : vector<4x1x8xf32>
    %cst_5 = arith.constant 9.99999974E-6 : f32
    %26 = vector.broadcast %cst_5 : f32 to vector<4x1x8xf32>
    %27 = arith.addf %25, %26 : vector<4x1x8xf32>
    %28 = math.rsqrt %27 : vector<4x1x8xf32>
    %29 = tpu.concatenate %21, %21, %21, %21 in 2 : vector<4x1x8xf32>, vector<4x1x8xf32>, vector<4x1x8xf32>, vector<4x1x8xf32> -> vector<4x1x32xf32>
    %30 = tpu.concatenate %28, %28, %28, %28 in 2 : vector<4x1x8xf32>, vector<4x1x8xf32>, vector<4x1x8xf32>, vector<4x1x8xf32> -> vector<4x1x32xf32>
    %31 = vector.broadcast %29 : vector<4x1x32xf32> to vector<4x8x32xf32>
    %32 = arith.subf %0, %31 : vector<4x8x32xf32>
    %33 = vector.broadcast %30 : vector<4x1x32xf32> to vector<4x8x32xf32>
    %34 = arith.mulf %32, %33 : vector<4x8x32xf32>
    %c0_6 = arith.constant 0 : index
    %c0_7 = arith.constant 0 : index
    %35 = vector.load %arg2[%c0_6, %c0_7] : memref<8x32xf32, #tpu.memory_space<vmem>>, vector<8x32xf32>
    %36 = vector.shape_cast %35 : vector<8x32xf32> to vector<1x8x32xf32>
    %37 = vector.broadcast %36 : vector<1x8x32xf32> to vector<4x8x32xf32>
    %38 = arith.mulf %34, %37 : vector<4x8x32xf32>
    %c0_8 = arith.constant 0 : index
    %c0_9 = arith.constant 0 : index
    %39 = vector.load %arg3[%c0_8, %c0_9] : memref<8x32xf32, #tpu.memory_space<vmem>>, vector<8x32xf32>
    %40 = vector.shape_cast %39 : vector<8x32xf32> to vector<1x8x32xf32>
    %41 = vector.broadcast %40 : vector<1x8x32xf32> to vector<4x8x32xf32>
    %42 = arith.addf %38, %41 : vector<4x8x32xf32>
    %43 = vector.shape_cast %42 : vector<4x8x32xf32> to vector<32x32xf32>
    %c0_10 = arith.constant 0 : index
    %c0_11 = arith.constant 0 : index
    %44 = vector.load %arg4[%c0_10, %c0_11] : memref<32x96xf32, #tpu.memory_space<vmem>>, vector<32x96xf32>
    %cst_12 = arith.constant dense<0.000000e+00> : vector<32x96xf32>
    %45 = tpu.matmul %43, %44, %cst_12 {dimension_numbers = #tpu.dot_dimension_numbers<[1], [0], [0], [1], [0, 0, 1, 1], [], []>} : vector<32x32xf32>, vector<32x96xf32>, vector<32x96xf32> -> vector<32x96xf32>
    %c0_13 = arith.constant 0 : index
    %c0_14 = arith.constant 0 : index
    %46 = vector.load %arg5[%c0_13, %c0_14] : memref<1x96xf32, #tpu.memory_space<vmem>>, vector<1x96xf32>
    %47 = vector.broadcast %46 : vector<1x96xf32> to vector<32x96xf32>
    %48 = arith.addf %45, %47 : vector<32x96xf32>
    %c0_15 = arith.constant 0 : index
    %c0_16 = arith.constant 0 : index
    %49 = vector.load %arg6[%c0_15, %c0_16] : memref<32x32xf32, #tpu.memory_space<vmem>>, vector<32x32xf32>
    %50 = vector.extract_strided_slice %48 {offsets = [0, 0], sizes = [32, 8], strides = [1, 1]} : vector<32x96xf32> to vector<32x8xf32>
    %51 = vector.shape_cast %50 : vector<32x8xf32> to vector<4x8x8xf32>
    %52 = vector.extract_strided_slice %48 {offsets = [0, 32], sizes = [32, 8], strides = [1, 1]} : vector<32x96xf32> to vector<32x8xf32>
    %53 = vector.shape_cast %52 : vector<32x8xf32> to vector<4x8x8xf32>
    %54 = vector.extract_strided_slice %48 {offsets = [0, 64], sizes = [32, 8], strides = [1, 1]} : vector<32x96xf32> to vector<32x8xf32>
    %55 = vector.shape_cast %54 : vector<32x8xf32> to vector<4x8x8xf32>
    "tpu.trace_start"() <{level = 10 : i32, message = "bnd,bmd->bnm"}> : () -> ()
    %cst_17 = arith.constant dense<0.000000e+00> : vector<4x8x8xf32>
    %56 = tpu.matmul %51, %53, %cst_17 {dimension_numbers = #tpu.dot_dimension_numbers<[2], [2], [1], [1], [0, 0, 0, 1, 1, 1], [0], [0]>} : vector<4x8x8xf32>, vector<4x8x8xf32>, vector<4x8x8xf32> -> vector<4x8x8xf32>
    "tpu.trace_stop"() : () -> ()
    %c0_18 = arith.constant 0 : index
    %c0_19 = arith.constant 0 : index
    %c0_20 = arith.constant 0 : index
    %57 = vector.load %arg8[%c0_18, %c0_19, %c0_20] : memref<4x8x8xf32, #tpu.memory_space<vmem>>, vector<1x8x8xf32>
    %58 = vector.shape_cast %57 : vector<1x8x8xf32> to vector<8x8xf32>
    %59 = vector.shape_cast %58 : vector<8x8xf32> to vector<1x8x8xf32>
    %60 = vector.broadcast %59 : vector<1x8x8xf32> to vector<4x8x8xf32>
    %61 = arith.addf %56, %60 : vector<4x8x8xf32>
    %c0_21 = arith.constant 0 : index
    %c0_22 = arith.constant 0 : index
    %c0_23 = arith.constant 0 : index
    %62 = vector.load %arg9[%c0_21, %c0_22, %c0_23] : memref<4x8x8xf32, #tpu.memory_space<vmem>>, vector<4x8x8xf32>
    %63 = arith.addf %61, %62 : vector<4x8x8xf32>
    %cst_24 = arith.constant dense<0xFF800000> : vector<4x8xf32>
    %64 = vector.multi_reduction <maximumf>, %63, %cst_24 [2] : vector<4x8x8xf32> to vector<4x8xf32>
    %65 = vector.shape_cast %64 : vector<4x8xf32> to vector<4x8x1xf32>
    %66 = vector.broadcast %65 : vector<4x8x1xf32> to vector<4x8x8xf32>
    %67 = arith.subf %63, %66 : vector<4x8x8xf32>
    %68 = math.exp %67 : vector<4x8x8xf32>
    %cst_25 = arith.constant dense<0.000000e+00> : vector<4x8xf32>
    %69 = vector.multi_reduction <add>, %68, %cst_25 [2] : vector<4x8x8xf32> to vector<4x8xf32>
    %70 = vector.shape_cast %69 : vector<4x8xf32> to vector<4x8x1xf32>
    %71 = tpu.reciprocal %70 {approx = true} : vector<4x8x1xf32> -> vector<4x8x1xf32>
    %72 = vector.broadcast %71 : vector<4x8x1xf32> to vector<4x8x8xf32>
    %73 = arith.mulf %68, %72 : vector<4x8x8xf32>
    "tpu.trace_start"() <{level = 10 : i32, message = "bnm,bmd->bnd"}> : () -> ()
    %cst_26 = arith.constant dense<0.000000e+00> : vector<4x8x8xf32>
    %74 = tpu.matmul %73, %55, %cst_26 {dimension_numbers = #tpu.dot_dimension_numbers<[2], [1], [1], [2], [0, 0, 0, 1, 1, 2], [0], [0]>} : vector<4x8x8xf32>, vector<4x8x8xf32>, vector<4x8x8xf32> -> vector<4x8x8xf32>
    "tpu.trace_stop"() : () -> ()
    %75 = vector.shape_cast %74 : vector<4x8x8xf32> to vector<32x8xf32>
    %76 = vector.extract_strided_slice %49 {offsets = [0, 0], sizes = [8, 32], strides = [1, 1]} : vector<32x32xf32> to vector<8x32xf32>
    %cst_27 = arith.constant dense<0.000000e+00> : vector<32x32xf32>
    %77 = tpu.matmul %75, %76, %cst_27 {dimension_numbers = #tpu.dot_dimension_numbers<[1], [0], [0], [1], [0, 0, 1, 1], [], []>} : vector<32x8xf32>, vector<8x32xf32>, vector<32x32xf32> -> vector<32x32xf32>
    %78 = vector.extract_strided_slice %48 {offsets = [0, 8], sizes = [32, 8], strides = [1, 1]} : vector<32x96xf32> to vector<32x8xf32>
    %79 = vector.shape_cast %78 : vector<32x8xf32> to vector<4x8x8xf32>
    %80 = vector.extract_strided_slice %48 {offsets = [0, 40], sizes = [32, 8], strides = [1, 1]} : vector<32x96xf32> to vector<32x8xf32>
    %81 = vector.shape_cast %80 : vector<32x8xf32> to vector<4x8x8xf32>
    %82 = vector.extract_strided_slice %48 {offsets = [0, 72], sizes = [32, 8], strides = [1, 1]} : vector<32x96xf32> to vector<32x8xf32>
    %83 = vector.shape_cast %82 : vector<32x8xf32> to vector<4x8x8xf32>
    "tpu.trace_start"() <{level = 10 : i32, message = "bnd,bmd->bnm"}> : () -> ()
    %cst_28 = arith.constant dense<0.000000e+00> : vector<4x8x8xf32>
    %84 = tpu.matmul %79, %81, %cst_28 {dimension_numbers = #tpu.dot_dimension_numbers<[2], [2], [1], [1], [0, 0, 0, 1, 1, 1], [0], [0]>} : vector<4x8x8xf32>, vector<4x8x8xf32>, vector<4x8x8xf32> -> vector<4x8x8xf32>
    "tpu.trace_stop"() : () -> ()
    %c1 = arith.constant 1 : index
    %c0_29 = arith.constant 0 : index
    %c0_30 = arith.constant 0 : index
    %85 = vector.load %arg8[%c1, %c0_29, %c0_30] : memref<4x8x8xf32, #tpu.memory_space<vmem>>, vector<1x8x8xf32>
    %86 = vector.shape_cast %85 : vector<1x8x8xf32> to vector<8x8xf32>
    %87 = vector.shape_cast %86 : vector<8x8xf32> to vector<1x8x8xf32>
    %88 = vector.broadcast %87 : vector<1x8x8xf32> to vector<4x8x8xf32>
    %89 = arith.addf %84, %88 : vector<4x8x8xf32>
    %c0_31 = arith.constant 0 : index
    %c0_32 = arith.constant 0 : index
    %c0_33 = arith.constant 0 : index
    %90 = vector.load %arg9[%c0_31, %c0_32, %c0_33] : memref<4x8x8xf32, #tpu.memory_space<vmem>>, vector<4x8x8xf32>
    %91 = arith.addf %89, %90 : vector<4x8x8xf32>
    %cst_34 = arith.constant dense<0xFF800000> : vector<4x8xf32>
    %92 = vector.multi_reduction <maximumf>, %91, %cst_34 [2] : vector<4x8x8xf32> to vector<4x8xf32>
    %93 = vector.shape_cast %92 : vector<4x8xf32> to vector<4x8x1xf32>
    %94 = vector.broadcast %93 : vector<4x8x1xf32> to vector<4x8x8xf32>
    %95 = arith.subf %91, %94 : vector<4x8x8xf32>
    %96 = math.exp %95 : vector<4x8x8xf32>
    %cst_35 = arith.constant dense<0.000000e+00> : vector<4x8xf32>
    %97 = vector.multi_reduction <add>, %96, %cst_35 [2] : vector<4x8x8xf32> to vector<4x8xf32>
    %98 = vector.shape_cast %97 : vector<4x8xf32> to vector<4x8x1xf32>
    %99 = tpu.reciprocal %98 {approx = true} : vector<4x8x1xf32> -> vector<4x8x1xf32>
    %100 = vector.broadcast %99 : vector<4x8x1xf32> to vector<4x8x8xf32>
    %101 = arith.mulf %96, %100 : vector<4x8x8xf32>
    "tpu.trace_start"() <{level = 10 : i32, message = "bnm,bmd->bnd"}> : () -> ()
    %cst_36 = arith.constant dense<0.000000e+00> : vector<4x8x8xf32>
    %102 = tpu.matmul %101, %83, %cst_36 {dimension_numbers = #tpu.dot_dimension_numbers<[2], [1], [1], [2], [0, 0, 0, 1, 1, 2], [0], [0]>} : vector<4x8x8xf32>, vector<4x8x8xf32>, vector<4x8x8xf32> -> vector<4x8x8xf32>
    "tpu.trace_stop"() : () -> ()
    %103 = vector.shape_cast %102 : vector<4x8x8xf32> to vector<32x8xf32>
    %104 = vector.extract_strided_slice %49 {offsets = [8, 0], sizes = [8, 32], strides = [1, 1]} : vector<32x32xf32> to vector<8x32xf32>
    %cst_37 = arith.constant dense<0.000000e+00> : vector<32x32xf32>
    %105 = tpu.matmul %103, %104, %cst_37 {dimension_numbers = #tpu.dot_dimension_numbers<[1], [0], [0], [1], [0, 0, 1, 1], [], []>} : vector<32x8xf32>, vector<8x32xf32>, vector<32x32xf32> -> vector<32x32xf32>
    %106 = arith.addf %77, %105 : vector<32x32xf32>
    %107 = vector.extract_strided_slice %48 {offsets = [0, 16], sizes = [32, 8], strides = [1, 1]} : vector<32x96xf32> to vector<32x8xf32>
    %108 = vector.shape_cast %107 : vector<32x8xf32> to vector<4x8x8xf32>
    %109 = vector.extract_strided_slice %48 {offsets = [0, 48], sizes = [32, 8], strides = [1, 1]} : vector<32x96xf32> to vector<32x8xf32>
    %110 = vector.shape_cast %109 : vector<32x8xf32> to vector<4x8x8xf32>
    %111 = vector.extract_strided_slice %48 {offsets = [0, 80], sizes = [32, 8], strides = [1, 1]} : vector<32x96xf32> to vector<32x8xf32>
    %112 = vector.shape_cast %111 : vector<32x8xf32> to vector<4x8x8xf32>
    "tpu.trace_start"() <{level = 10 : i32, message = "bnd,bmd->bnm"}> : () -> ()
    %cst_38 = arith.constant dense<0.000000e+00> : vector<4x8x8xf32>
    %113 = tpu.matmul %108, %110, %cst_38 {dimension_numbers = #tpu.dot_dimension_numbers<[2], [2], [1], [1], [0, 0, 0, 1, 1, 1], [0], [0]>} : vector<4x8x8xf32>, vector<4x8x8xf32>, vector<4x8x8xf32> -> vector<4x8x8xf32>
    "tpu.trace_stop"() : () -> ()
    %c2 = arith.constant 2 : index
    %c0_39 = arith.constant 0 : index
    %c0_40 = arith.constant 0 : index
    %114 = vector.load %arg8[%c2, %c0_39, %c0_40] : memref<4x8x8xf32, #tpu.memory_space<vmem>>, vector<1x8x8xf32>
    %115 = vector.shape_cast %114 : vector<1x8x8xf32> to vector<8x8xf32>
    %116 = vector.shape_cast %115 : vector<8x8xf32> to vector<1x8x8xf32>
    %117 = vector.broadcast %116 : vector<1x8x8xf32> to vector<4x8x8xf32>
    %118 = arith.addf %113, %117 : vector<4x8x8xf32>
    %c0_41 = arith.constant 0 : index
    %c0_42 = arith.constant 0 : index
    %c0_43 = arith.constant 0 : index
    %119 = vector.load %arg9[%c0_41, %c0_42, %c0_43] : memref<4x8x8xf32, #tpu.memory_space<vmem>>, vector<4x8x8xf32>
    %120 = arith.addf %118, %119 : vector<4x8x8xf32>
    %cst_44 = arith.constant dense<0xFF800000> : vector<4x8xf32>
    %121 = vector.multi_reduction <maximumf>, %120, %cst_44 [2] : vector<4x8x8xf32> to vector<4x8xf32>
    %122 = vector.shape_cast %121 : vector<4x8xf32> to vector<4x8x1xf32>
    %123 = vector.broadcast %122 : vector<4x8x1xf32> to vector<4x8x8xf32>
    %124 = arith.subf %120, %123 : vector<4x8x8xf32>
    %125 = math.exp %124 : vector<4x8x8xf32>
    %cst_45 = arith.constant dense<0.000000e+00> : vector<4x8xf32>
    %126 = vector.multi_reduction <add>, %125, %cst_45 [2] : vector<4x8x8xf32> to vector<4x8xf32>
    %127 = vector.shape_cast %126 : vector<4x8xf32> to vector<4x8x1xf32>
    %128 = tpu.reciprocal %127 {approx = true} : vector<4x8x1xf32> -> vector<4x8x1xf32>
    %129 = vector.broadcast %128 : vector<4x8x1xf32> to vector<4x8x8xf32>
    %130 = arith.mulf %125, %129 : vector<4x8x8xf32>
    "tpu.trace_start"() <{level = 10 : i32, message = "bnm,bmd->bnd"}> : () -> ()
    %cst_46 = arith.constant dense<0.000000e+00> : vector<4x8x8xf32>
    %131 = tpu.matmul %130, %112, %cst_46 {dimension_numbers = #tpu.dot_dimension_numbers<[2], [1], [1], [2], [0, 0, 0, 1, 1, 2], [0], [0]>} : vector<4x8x8xf32>, vector<4x8x8xf32>, vector<4x8x8xf32> -> vector<4x8x8xf32>
    "tpu.trace_stop"() : () -> ()
    %132 = vector.shape_cast %131 : vector<4x8x8xf32> to vector<32x8xf32>
    %133 = vector.extract_strided_slice %49 {offsets = [16, 0], sizes = [8, 32], strides = [1, 1]} : vector<32x32xf32> to vector<8x32xf32>
    %cst_47 = arith.constant dense<0.000000e+00> : vector<32x32xf32>
    %134 = tpu.matmul %132, %133, %cst_47 {dimension_numbers = #tpu.dot_dimension_numbers<[1], [0], [0], [1], [0, 0, 1, 1], [], []>} : vector<32x8xf32>, vector<8x32xf32>, vector<32x32xf32> -> vector<32x32xf32>
    %135 = arith.addf %106, %134 : vector<32x32xf32>
    %136 = vector.extract_strided_slice %48 {offsets = [0, 24], sizes = [32, 8], strides = [1, 1]} : vector<32x96xf32> to vector<32x8xf32>
    %137 = vector.shape_cast %136 : vector<32x8xf32> to vector<4x8x8xf32>
    %138 = vector.extract_strided_slice %48 {offsets = [0, 56], sizes = [32, 8], strides = [1, 1]} : vector<32x96xf32> to vector<32x8xf32>
    %139 = vector.shape_cast %138 : vector<32x8xf32> to vector<4x8x8xf32>
    %140 = vector.extract_strided_slice %48 {offsets = [0, 88], sizes = [32, 8], strides = [1, 1]} : vector<32x96xf32> to vector<32x8xf32>
    %141 = vector.shape_cast %140 : vector<32x8xf32> to vector<4x8x8xf32>
    "tpu.trace_start"() <{level = 10 : i32, message = "bnd,bmd->bnm"}> : () -> ()
    %cst_48 = arith.constant dense<0.000000e+00> : vector<4x8x8xf32>
    %142 = tpu.matmul %137, %139, %cst_48 {dimension_numbers = #tpu.dot_dimension_numbers<[2], [2], [1], [1], [0, 0, 0, 1, 1, 1], [0], [0]>} : vector<4x8x8xf32>, vector<4x8x8xf32>, vector<4x8x8xf32> -> vector<4x8x8xf32>
    "tpu.trace_stop"() : () -> ()
    %c3 = arith.constant 3 : index
    %c0_49 = arith.constant 0 : index
    %c0_50 = arith.constant 0 : index
    %143 = vector.load %arg8[%c3, %c0_49, %c0_50] : memref<4x8x8xf32, #tpu.memory_space<vmem>>, vector<1x8x8xf32>
    %144 = vector.shape_cast %143 : vector<1x8x8xf32> to vector<8x8xf32>
    %145 = vector.shape_cast %144 : vector<8x8xf32> to vector<1x8x8xf32>
    %146 = vector.broadcast %145 : vector<1x8x8xf32> to vector<4x8x8xf32>
    %147 = arith.addf %142, %146 : vector<4x8x8xf32>
    %c0_51 = arith.constant 0 : index
    %c0_52 = arith.constant 0 : index
    %c0_53 = arith.constant 0 : index
    %148 = vector.load %arg9[%c0_51, %c0_52, %c0_53] : memref<4x8x8xf32, #tpu.memory_space<vmem>>, vector<4x8x8xf32>
    %149 = arith.addf %147, %148 : vector<4x8x8xf32>
    %cst_54 = arith.constant dense<0xFF800000> : vector<4x8xf32>
    %150 = vector.multi_reduction <maximumf>, %149, %cst_54 [2] : vector<4x8x8xf32> to vector<4x8xf32>
    %151 = vector.shape_cast %150 : vector<4x8xf32> to vector<4x8x1xf32>
    %152 = vector.broadcast %151 : vector<4x8x1xf32> to vector<4x8x8xf32>
    %153 = arith.subf %149, %152 : vector<4x8x8xf32>
    %154 = math.exp %153 : vector<4x8x8xf32>
    %cst_55 = arith.constant dense<0.000000e+00> : vector<4x8xf32>
    %155 = vector.multi_reduction <add>, %154, %cst_55 [2] : vector<4x8x8xf32> to vector<4x8xf32>
    %156 = vector.shape_cast %155 : vector<4x8xf32> to vector<4x8x1xf32>
    %157 = tpu.reciprocal %156 {approx = true} : vector<4x8x1xf32> -> vector<4x8x1xf32>
    %158 = vector.broadcast %157 : vector<4x8x1xf32> to vector<4x8x8xf32>
    %159 = arith.mulf %154, %158 : vector<4x8x8xf32>
    "tpu.trace_start"() <{level = 10 : i32, message = "bnm,bmd->bnd"}> : () -> ()
    %cst_56 = arith.constant dense<0.000000e+00> : vector<4x8x8xf32>
    %160 = tpu.matmul %159, %141, %cst_56 {dimension_numbers = #tpu.dot_dimension_numbers<[2], [1], [1], [2], [0, 0, 0, 1, 1, 2], [0], [0]>} : vector<4x8x8xf32>, vector<4x8x8xf32>, vector<4x8x8xf32> -> vector<4x8x8xf32>
    "tpu.trace_stop"() : () -> ()
    %161 = vector.shape_cast %160 : vector<4x8x8xf32> to vector<32x8xf32>
    %162 = vector.extract_strided_slice %49 {offsets = [24, 0], sizes = [8, 32], strides = [1, 1]} : vector<32x32xf32> to vector<8x32xf32>
    %cst_57 = arith.constant dense<0.000000e+00> : vector<32x32xf32>
    %163 = tpu.matmul %161, %162, %cst_57 {dimension_numbers = #tpu.dot_dimension_numbers<[1], [0], [0], [1], [0, 0, 1, 1], [], []>} : vector<32x8xf32>, vector<8x32xf32>, vector<32x32xf32> -> vector<32x32xf32>
    %164 = arith.addf %135, %163 : vector<32x32xf32>
    %c0_58 = arith.constant 0 : index
    %c0_59 = arith.constant 0 : index
    %165 = vector.load %arg7[%c0_58, %c0_59] : memref<1x32xf32, #tpu.memory_space<vmem>>, vector<1x32xf32>
    %166 = vector.broadcast %165 : vector<1x32xf32> to vector<32x32xf32>
    %167 = arith.addf %164, %166 : vector<32x32xf32>
    %168 = vector.shape_cast %167 : vector<32x32xf32> to vector<4x8x32xf32>
    %c0_60 = arith.constant 0 : index
    %c0_61 = arith.constant 0 : index
    %c0_62 = arith.constant 0 : index
    %169 = vector.load %arg10[%c0_60, %c0_61, %c0_62] : memref<4x8x32xf32, #tpu.memory_space<vmem>>, vector<4x8x32xf32>
    tpu.vector_store %arg10[%c0_60, %c0_61, %c0_62], %168 {strides = array<i32>} : memref<4x8x32xf32, #tpu.memory_space<vmem>>, vector<4x8x32xf32>,
    return
  }
  func.func @transform_0(%arg0: i32) -> (i32, i32, i32) {
    %c0_i32 = arith.constant 0 : i32
    %c0_i32_0 = arith.constant 0 : i32
    %c0_i32_1 = arith.constant 0 : i32
    return %arg0, %c0_i32, %c0_i32_0 : i32, i32, i32
  }
  func.func @transform_1(%arg0: i32) -> (i32, i32) {
    %c0_i32 = arith.constant 0 : i32
    %c0_i32_0 = arith.constant 0 : i32
    %c0_i32_1 = arith.constant 0 : i32
    return %c0_i32, %c0_i32_0 : i32, i32
  }
  func.func @transform_2(%arg0: i32) -> (i32, i32) {
    %c0_i32 = arith.constant 0 : i32
    %c0_i32_0 = arith.constant 0 : i32
    %c0_i32_1 = arith.constant 0 : i32
    return %c0_i32, %c0_i32_0 : i32, i32
  }
  func.func @transform_3(%arg0: i32) -> (i32, i32) {
    %c0_i32 = arith.constant 0 : i32
    %c0_i32_0 = arith.constant 0 : i32
    %c0_i32_1 = arith.constant 0 : i32
    return %c0_i32, %c0_i32_0 : i32, i32
  }
  func.func @transform_4(%arg0: i32) -> (i32, i32) {
    %c0_i32 = arith.constant 0 : i32
    %c0_i32_0 = arith.constant 0 : i32
    %c0_i32_1 = arith.constant 0 : i32
    return %c0_i32, %c0_i32_0 : i32, i32
  }
  func.func @transform_5(%arg0: i32) -> (i32, i32) {
    %c0_i32 = arith.constant 0 : i32
    %c0_i32_0 = arith.constant 0 : i32
    %c0_i32_1 = arith.constant 0 : i32
    return %c0_i32, %c0_i32_0 : i32, i32
  }
  func.func @transform_6(%arg0: i32) -> (i32, i32) {
    %c0_i32 = arith.constant 0 : i32
    %c0_i32_0 = arith.constant 0 : i32
    %c0_i32_1 = arith.constant 0 : i32
    return %c0_i32, %c0_i32_0 : i32, i32
  }
  func.func @transform_7(%arg0: i32) -> (i32, i32, i32) {
    %c0_i32 = arith.constant 0 : i32
    %c0_i32_0 = arith.constant 0 : i32
    %c0_i32_1 = arith.constant 0 : i32
    %c0_i32_2 = arith.constant 0 : i32
    return %c0_i32, %c0_i32_0, %c0_i32_1 : i32, i32, i32
  }
  func.func @transform_8(%arg0: i32) -> (i32, i32, i32) {
    %c0_i32 = arith.constant 0 : i32
    %c0_i32_0 = arith.constant 0 : i32
    %c0_i32_1 = arith.constant 0 : i32
    return %arg0, %c0_i32, %c0_i32_0 : i32, i32, i32
  }
  func.func @transform_9(%arg0: i32) -> (i32, i32, i32) {
    %c0_i32 = arith.constant 0 : i32
    %c0_i32_0 = arith.constant 0 : i32
    %c0_i32_1 = arith.constant 0 : i32
    return %arg0, %c0_i32, %c0_i32_0 : i32, i32, i32
  }
}

</mosaic_0001>

<bundles_post_ra>
// kernel: tpu_custom_call.1
= control target key start
LH: loop header
LB: loop body
LE: loop exit
PB: predicated region body
PF: predicated region fallthrough
CT: control target
= control target key end

     0   :  { %14 = vsyncpa [#allocation3], 0  ;;  %s2828_s0 = inlined_call_operand.hbm [shape: f32[4,8,32], index: 0, kind: input, shape index: {}]   ;;  %s2829_s1 = inlined_call_operand.hbm [shape: f32[8,32], index: 1, kind: input, shape index: {}]   ;;  %s2830_s2 = inlined_call_operand.hbm [shape: f32[8,32], index: 2, kind: input, shape index: {}]   ;;  %s2831_s3 = inlined_call_operand.hbm [shape: f32[32,96], index: 3, kind: input, shape index: {}]   ;;  %s2832_s4 = inlined_call_operand.vmem [shape: f32[1,96], index: 4, kind: input, shape index: {}]   ;;  %s2833_s5 = inlined_call_operand.hbm [shape: f32[32,32], index: 5, kind: input, shape index: {}]   ;;  %s2834_s6 = inlined_call_operand.vmem [shape: f32[1,32], index: 6, kind: input, shape index: {}]   ;;  %s2835_s7 = inlined_call_operand.hbm [shape: f32[4,8,8], index: 7, kind: input, shape index: {}]   ;;  %s2836_s8 = inlined_call_operand.hbm [shape: f32[4,8,8], index: 8, kind: input, shape index: {}]   ;;  %s2837_s9 = inlined_call_operand.hbm [shape: f32[4,8,32], index: 9, kind: output, shape index: {}]  }
   0x1   :  { %15 = vsyncpa [#allocation6], 0 }
   0x2   :  { %16 = vsyncpa [#allocation9], 0 }
   0x3   :  { %17 = vsyncpa [#allocation12], 0  ;;  %s37_s11 = sshll.u32 %s2829_s1, 4  ;;  %s38_s11 = int_to_ptr.hbm [resolvable:$true] %s37_s11 }
   0x4   :  { %18 = vsyncpa [#allocation4], 0  ;;  %s2222_s12 = smov [#allocation5]   ;;  %s58_s16 = sshll.u32 %s2831_s3, 4  ;;  %s59_s16 = int_to_ptr.hbm [resolvable:$true] %s58_s16 }
   0x5   :  { %s39_s13 = sshll.u32 %s2222_s12, 4  ;;  %s2223_s17 = smov [#allocation8]   ;;  %s40_s13 = int_to_ptr.vmem [resolvable:$true] %s39_s13 }
   0x6   :  { %42 = dma.hbm_to_vmem [thread:$0]  %s38_s11, 128, %s40_s13, [#allocation6]  }
   0x7   :  { %s60_s18 = sshll.u32 %s2223_s17, 4  ;;  %s88_s21 = sshll.u32 %s2835_s7, 4  ;;  %s61_s18 = int_to_ptr.vmem [resolvable:$true] %s60_s18  ;;  %s89_s21 = int_to_ptr.hbm [resolvable:$true] %s88_s21 }
   0x8   :  { %s2224_s1 = smov 128   ;;  %s2225_s22 = smov 8  }
   0x9   :  { %66 = dma.hbm_to_vmem [thread:$0]  %s59_s16, 512, %s61_s18, [#allocation9], %s2224_s1, %s2224_s1, %s2225_s22  }
   0xa   :  { %s23_s25 = sshll.u32 %s2828_s0, 4  ;;  %s2226_s3 = smov [#allocation11]   ;;  %s24_s25 = int_to_ptr.hbm [resolvable:$true] %s23_s25 }
   0xb   :  { %s90_s26 = sshll.u32 %s2226_s3, 4  ;;  %s2227_s7 = smov [#allocation2]   ;;  %s91_s26 = int_to_ptr.vmem [resolvable:$true] %s90_s26 }
   0xc   :  { %96 = dma.hbm_to_vmem [thread:$0]  %s89_s21, 512, %s91_s26, [#allocation12], %s2224_s1, %s2224_s1, %s2225_s22  }
   0xd   :  { %s25_s27 = sshll.u32 %s2227_s7, 4  ;;  %s48_s30 = sshll.u32 %s2830_s2, 4  ;;  %s26_s27 = int_to_ptr.vmem [resolvable:$true] %s25_s27  ;;  %s49_s30 = int_to_ptr.hbm [resolvable:$true] %s48_s30 }
   0xe   :  { %31 = dma.hbm_to_vmem [thread:$0]  %s24_s25, 512, %s26_s27, [#allocation3], %s2224_s1, %s2224_s1, %s2225_s22  }
   0xf   :  { %s73_s11 = sshll.u32 %s2833_s5, 4  ;;  %s2228_s12 = smov [#allocation7]   ;;  %s74_s11 = int_to_ptr.hbm [resolvable:$true] %s73_s11 }
  0x10   :  { %s50_s13 = sshll.u32 %s2228_s12, 4  ;;  %s2229_s14 = smov [#allocation10]   ;;  %s51_s13 = int_to_ptr.vmem [resolvable:$true] %s50_s13 }
  0x11   :  { %53 = dma.hbm_to_vmem [thread:$0]  %s49_s30, 128, %s51_s13, [#allocation6]  }
  0x12   :  { %s75_s15 = sshll.u32 %s2229_s14, 4  ;;  %s101_s2 = sshll.u32 %s2836_s8, 4  ;;  %s76_s15 = int_to_ptr.vmem [resolvable:$true] %s75_s15  ;;  %s102_s2 = int_to_ptr.hbm [resolvable:$true] %s101_s2 }
  0x13   :  { %81 = dma.hbm_to_vmem [thread:$0]  %s74_s11, 512, %s76_s15, [#allocation9], %s2224_s1, %s2224_s1, %s2225_s22  }
  0x14   :  { %s2230_s18 = smov [#allocation13]  }
  0x15   :  { %s103_s19 = sshll.u32 %s2230_s18, 4  ;;  %s104_s19 = int_to_ptr.vmem [resolvable:$true] %s103_s19 }
  0x16   :  { %109 = dma.hbm_to_vmem [thread:$0]  %s102_s2, 512, %s104_s19, [#allocation12], %s2224_s1, %s2224_s1, %s2225_s22  }
  0x17   :  { %2212 = dma.done.wait [#allocation3], 512  }
  0x18   :  { %2213 = vsyncadd [#allocation3], 4294966784 }
  0x19   :  { %2214 = dma.done.wait [#allocation6], 256  }
  0x1a   :  { %2215 = vsyncadd [#allocation6], 4294967040 }
  0x1b   :  { %2216 = dma.done.wait [#allocation9], 1024  }
  0x1c   :  { %2217 = vsyncadd [#allocation9], 4294966272 }
  0x1d   :  { %2218 = dma.done.wait [#allocation12], 1024  }
  0x1e   :  { %2219 = vsyncadd [#allocation12], 4294966272  ;;  %vm142_vm0 = vcmask 261120   ;;  %v2331_v0 = vld [vmem:[#allocation2] sm:$0xff]  ;;  %v2333_v1 = vld [vmem:[#allocation2 + $0x8] sm:$0xff]  ;;  %s2231_s5 = smov 112  }
  0x1f   :  { %v143_v2 = vsel %vm142_vm0, %v2331_v0, 0.0  ;;  %v171_v3 = vmul.f32 %v2331_v0, %v2331_v0  ;;  %v150_v4 = vsel %vm142_vm0, %v2333_v1, 0.0  ;;  %v172_v5 = vmul.f32 %v2333_v1, %v2333_v1  ;;  %v2347_v24 = vld [vmem:[#allocation2 + $0x10] sm:$0xff]  ;;  %s2232_s8 = smov 120   ;;  %s2233_s20 = smov 104   ;;  %v2372_v40 = vld [vmem:[#allocation2 + $0x18] sm:$0xff] }
  0x20   :  { %v144_v6 = vrot.slane %v143_v2, 4  ;;  %v151_v7 = vrot.slane %v150_v4, 4  ;;  %v173_v28 = vmul.f32 %v2347_v24, %v2347_v24  ;;  %v157_v33 = vsel %vm142_vm0, %v2347_v24, 0.0  ;;  %s2234_s21 = smov 24   ;;  %s2235_s23 = smov 16  }
  0x21   :  { %v175_v8 = vsel %vm142_vm0, %v171_v3, 0.0  ;;  %v182_v9 = vsel %vm142_vm0, %v172_v5, 0.0  ;;  %v158_v36 = vrot.slane %v157_v33, 4  ;;  %v174_v43 = vmul.f32 %v2372_v40, %v2372_v40  ;;  %s2236_s3 = smov 96   ;;  %s2238_s26 = smov 64  }
  0x22   :  { %v145_v10 = vadd.f32 %v144_v6, %v143_v2  ;;  %v176_v11 = vrot.slane %v175_v8, 4  ;;  %v152_v12 = vadd.f32 %v151_v7, %v150_v4  ;;  %v183_v16 = vrot.slane %v182_v9, 4  ;;  %s2239_s7 = smov 56   ;;  %s2240_s27 = smov 80  }
  0x23   :  { %v189_v32 = vsel %vm142_vm0, %v173_v28, 0.0  ;;  %v159_v39 = vadd.f32 %v158_v36, %v157_v33  ;;  %v196_v46 = vsel %vm142_vm0, %v174_v43, 0.0  ;;  %v164_v47 = vsel %vm142_vm0, %v2372_v40, 0.0  ;;  %s2241_s28 = smov 72   ;;  %s2242_s29 = smov 48  }
  0x24   :  { %v146_v13 = vrot.slane %v145_v10, 2  ;;  %v177_v14 = vadd.f32 %v176_v11, %v175_v8  ;;  %v153_v15 = vrot.slane %v152_v12, 2  ;;  %v184_v22 = vadd.f32 %v183_v16, %v182_v9  ;;  %s2243_s30 = smov 40   ;;  %s1818_s14 = sshll.u32 %s2837_s9, 4  ;;  %s1819_s14 = int_to_ptr.hbm [resolvable:$true] %s1818_s14 }
  0x25   :  { %v190_v35 = vrot.slane %v189_v32, 4  ;;  %v160_v42 = vrot.slane %v159_v39, 2  ;;  %v197_v50 = vrot.slane %v196_v46, 4  ;;  %v165_v51 = vrot.slane %v164_v47, 4 }
  0x26   :  { %v147_v17 = vadd.f32 %v146_v13, %v145_v10  ;;  %v178_v18 = vrot.slane %v177_v14, 2  ;;  %v154_v21 = vadd.f32 %v153_v15, %v152_v12  ;;  %v185_v27 = vrot.slane %v184_v22, 2 }
  0x27   :  { %v191_v38 = vadd.f32 %v190_v35, %v189_v32  ;;  %v161_v45 = vadd.f32 %v160_v42, %v159_v39  ;;  %v198_v54 = vadd.f32 %v197_v50, %v196_v46  ;;  %v166_v55 = vadd.f32 %v165_v51, %v164_v47 }
  0x28   :  { %v148_v19 = vrot.slane %v147_v17, 1  ;;  %v179_v20 = vadd.f32 %v178_v18, %v177_v14  ;;  %v155_v26 = vrot.slane %v154_v21, 1  ;;  %v186_v31 = vadd.f32 %v185_v27, %v184_v22 }
  0x29   :  { %v192_v41 = vrot.slane %v191_v38, 2  ;;  %v162_v49 = vrot.slane %v161_v45, 1  ;;  %v199_v56 = vrot.slane %v198_v54, 2  ;;  %v167_v57 = vrot.slane %v166_v55, 2 }
  0x2a   :  { %v2345_v23 = vadd.f32 %v148_v19, %v147_v17  ;;  %v180_v25 = vrot.slane %v179_v20, 1  ;;  %v2359_v30 = vadd.f32 %v155_v26, %v154_v21  ;;  %v187_v34 = vrot.slane %v186_v31, 1 }
  0x2b   :  { %v193_v44 = vadd.f32 %v192_v41, %v191_v38  ;;  %v2393_v53 = vadd.f32 %v162_v49, %v161_v45  ;;  %v200_v58 = vadd.f32 %v199_v56, %v198_v54  ;;  %v168_v59 = vadd.f32 %v167_v57, %v166_v55 }
  0x2c   :  { %243 = vrot.lane.b32.xlu1 %v2345_v23, %s2231_s5  ;;  %207 = vrot.lane.b32.xlu0 %v2345_v23, %s2232_s8  ;;  %v2357_v29 = vadd.f32 %v180_v25, %v179_v20  ;;  %v2370_v37 = vadd.f32 %v187_v34, %v186_v31  ;;  %vm407_vm13 = vcmask 64512   ;;  %vm412_vm14 = vcmask 130048  }
  0x2d   :  { %275 = vrot.lane.b32.xlu2 %v2345_v23, %s2233_s20  ;;  %v194_v48 = vrot.slane %v193_v44, 1  ;;  %v201_v60 = vrot.slane %v200_v58, 1  ;;  %v169_v61 = vrot.slane %v168_v59, 1  ;;  %vm417_vm15 = vcmask 195584  }
  0x2f   :  { %v2391_v52 = vadd.f32 %v194_v48, %v193_v44  ;;  %v2407_v62 = vadd.f32 %v201_v60, %v200_v58  ;;  %v2409_v63 = vadd.f32 %v169_v61, %v168_v59 }
  0x34   :  { %259 = vrot.lane.b32.xlu1 %v2357_v29, %s2231_s5  ;;  %209 = vrot.lane.b32.xlu0 %v2359_v30, %s2232_s8 }
  0x35   :  { %245 = vrot.lane.b32.xlu2 %v2359_v30, %s2231_s5 }
  0x3c   :  { %229 = vrot.lane.b32.xlu1 %v2370_v37, %s2232_s8  ;;  %227 = vrot.lane.b32.xlu0 %v2357_v29, %s2232_s8 }
  0x3d   :  { %291 = vrot.lane.b32.xlu2 %v2357_v29, %s2233_s20 }
  0x44   :  { %277 = vrot.lane.b32.xlu1 %v2359_v30, %s2233_s20  ;;  %261 = vrot.lane.b32.xlu0 %v2370_v37, %s2231_s5 }
  0x45   :  { %293 = vrot.lane.b32.xlu2 %v2370_v37, %s2233_s20 }
  0x4c   :  { %231 = vrot.lane.b32.xlu1 %v2391_v52, %s2232_s8  ;;  %211 = vrot.lane.b32.xlu0 %v2393_v53, %s2232_s8 }
  0x4d   :  { %247 = vrot.lane.b32.xlu2 %v2393_v53, %s2231_s5 }
  0x54   :  { %279 = vrot.lane.b32.xlu1 %v2393_v53, %s2233_s20  ;;  %263 = vrot.lane.b32.xlu0 %v2391_v52, %s2231_s5 }
  0x55   :  { %295 = vrot.lane.b32.xlu2 %v2391_v52, %s2233_s20 }
  0x5c   :  { %233 = vrot.lane.b32.xlu1 %v2407_v62, %s2232_s8  ;;  %213 = vrot.lane.b32.xlu0 %v2409_v63, %s2232_s8 }
  0x5d   :  { %249 = vrot.lane.b32.xlu2 %v2409_v63, %s2231_s5 }
  0x64   :  { %281 = vrot.lane.b32.xlu1 %v2409_v63, %s2233_s20  ;;  %265 = vrot.lane.b32.xlu0 %v2407_v62, %s2231_s5 }
  0x65   :  { %297 = vrot.lane.b32.xlu2 %v2407_v62, %s2233_s20 }
  0x87   :  { %v276_v2 = vpop.permute.xlu2 %275 }
  0x8f   :  { %v246_v3 = vpop.permute.xlu2 %245 }
  0x97   :  { %v292_v9 = vpop.permute.xlu2 %291 }
  0x9e   :  { %v244_v4 = vpop.permute.xlu1 %243  ;;  %v208_v5 = vpop.permute.xlu0 %207 }
  0x9f   :  { %v219_v6 = vadd.f32 %v208_v5, %v2345_v23  ;;  %v294_v13 = vpop.permute.xlu2 %293 }
  0xa1   :  { %v255_v7 = vadd.f32 %v244_v4, %v219_v6 }
  0xa3   :  { %v287_v8 = vadd.f32 %v276_v2, %v255_v7 }
  0xa5   :  { %v2424_v10 = vmul.f32 0.03125, %v287_v8 }
  0xa6   :  { %v260_v11 = vpop.permute.xlu1 %259  ;;  %v210_v12 = vpop.permute.xlu0 %209 }
  0xa7   :  { %395 = vrot.lane.b32.xlu2 %v2424_v10, %s2234_s21  ;;  %383 = vrot.lane.b32.xlu1 %v2424_v10, %s2235_s23  ;;  %v220_v17 = vadd.f32 %v210_v12, %v2359_v30  ;;  %v315_v23 = vmul.f32 %v2424_v10, %v2424_v10  ;;  %v248_v32 = vpop.permute.xlu2 %247 }
  0xa8   :  { %371 = vrot.lane.b32.xlu0 %v2424_v10, %s2225_s22 }
  0xa9   :  { %v256_v20 = vadd.f32 %v246_v3, %v220_v17 }
  0xae   :  { %v230_v14 = vpop.permute.xlu1 %229  ;;  %v228_v15 = vpop.permute.xlu0 %227 }
  0xaf   :  { %v239_v16 = vadd.f32 %v228_v15, %v2357_v29  ;;  %v240_v21 = vadd.f32 %v230_v14, %v2370_v37  ;;  %v296_v43 = vpop.permute.xlu2 %295 }
  0xb1   :  { %v271_v18 = vadd.f32 %v260_v11, %v239_v16 }
  0xb3   :  { %v303_v19 = vadd.f32 %v292_v9, %v271_v18 }
  0xb5   :  { %v311_v22 = vmul.f32 0.03125, %v303_v19 }
  0xb6   :  { %v278_v25 = vpop.permute.xlu1 %277  ;;  %v262_v26 = vpop.permute.xlu0 %261 }
  0xb7   :  { %v319_v27 = vsub.f32 %v311_v22, %v315_v23  ;;  %v288_v28 = vadd.f32 %v278_v25, %v256_v20  ;;  %v272_v31 = vadd.f32 %v262_v26, %v240_v21 }
  0xb9   :  { %v323_v33 = vadd.f32 1e-05, %v319_v27  ;;  %v2437_v34 = vmul.f32 0.03125, %v288_v28  ;;  %v304_v29 = vadd.f32 %v294_v13, %v272_v31 }
  0xbb   :  { %1948 = vrsqrt.f32 %v323_v33  ;;  %v312_v30 = vmul.f32 0.03125, %v304_v29  ;;  %v316_v35 = vmul.f32 %v2437_v34, %v2437_v34  ;;  %397 = vrot.lane.b32.xlu2 %v2437_v34, %s2234_s21  ;;  %385 = vrot.lane.b32.xlu1 %v2437_v34, %s2235_s23  ;;  %vm333_vm2 = vweird.f32 %v323_v33 }
  0xbc   :  { %373 = vrot.lane.b32.xlu0 %v2437_v34, %s2225_s22 }
  0xbd   :  { %v320_v36 = vsub.f32 %v312_v30, %v316_v35 }
  0xbe   :  { %v232_v37 = vpop.permute.xlu1 %231  ;;  %v212_v38 = vpop.permute.xlu0 %211 }
  0xbf   :  { %v324_v39 = vadd.f32 1e-05, %v320_v36  ;;  %v221_v42 = vadd.f32 %v212_v38, %v2393_v53  ;;  %v241_v46 = vadd.f32 %v232_v37, %v2391_v52  ;;  %v250_v52 = vpop.permute.xlu2 %249 }
  0xc1   :  { %v1949_v41 = vpop.eup %1948  ;;  %1950 = vrsqrt.f32 %v324_v39  ;;  %v257_v47 = vadd.f32 %v248_v32, %v221_v42  ;;  %vm343_vm5 = vweird.f32 %v324_v39 }
  0xc2   :  { %v328_v44 = vmul.f32 %v1949_v41, %v323_v33  ;;  %vm334_vm1 = vweird.f32 %v1949_v41 }
  0xc3   :  { %vm335_vm3 = vmor %vm333_vm2, %vm334_vm1 }
  0xc4   :  { %v329_v45 = vmul.f32 %v1949_v41, %v328_v44  ;;  %v502_v44 = vld [vmem:[#allocation8 + $0x10] sm:$0xff] }
  0xc6   :  { %v280_v48 = vpop.permute.xlu1 %279  ;;  %v264_v49 = vpop.permute.xlu0 %263  ;;  %v330_v50 = vmul.f32 0.5, %v329_v45 }
  0xc7   :  { %v1951_v51 = vpop.eup %1950  ;;  %v289_v54 = vadd.f32 %v280_v48, %v257_v47  ;;  %v273_v55 = vadd.f32 %v264_v49, %v241_v46  ;;  %v298_v14 = vpop.permute.xlu2 %297  ;;  %v501_v48 = vld [vmem:[#allocation8 + $0x8] sm:$0xff]  ;;  %v500_v49 = vld [vmem:[#allocation8] sm:$0xff] }
  0xc8   :  { %v338_v56 = vmul.f32 %v1951_v51, %v324_v39  ;;  %v331_v60 = vsub.f32 1.5, %v330_v50  ;;  %vm344_vm4 = vweird.f32 %v1951_v51 }
  0xc9   :  { %v2449_v57 = vmul.f32 0.03125, %v289_v54  ;;  %v305_v58 = vadd.f32 %v296_v43, %v273_v55  ;;  %vm345_vm6 = vmor %vm343_vm5, %vm344_vm4  ;;  %v503_v43 = vld [vmem:[#allocation8 + $0x18] sm:$0xff] }
  0xca   :  { %v339_v59 = vmul.f32 %v1951_v51, %v338_v56  ;;  %v332_v5 = vmul.f32 %v1949_v41, %v331_v60  ;;  %532 = vmatpush.msra.mxu0 %v503_v43 }
  0xcb   :  { %v313_v61 = vmul.f32 0.03125, %v305_v58  ;;  %v317_v53 = vmul.f32 %v2449_v57, %v2449_v57  ;;  %399 = vrot.lane.b32.xlu2 %v2449_v57, %s2234_s21  ;;  %387 = vrot.lane.b32.xlu1 %v2449_v57, %s2235_s23 }
  0xcc   :  { %375 = vrot.lane.b32.xlu0 %v2449_v57, %s2225_s22  ;;  %v340_v6 = vmul.f32 0.5, %v339_v59  ;;  %v2460_v9 = vsel %vm335_vm3, %v1949_v41, %v332_v5  ;;  %533 = vmatpush.msra.mxu0 %v502_v44 }
  0xcd   :  { %v321_v2 = vsub.f32 %v313_v61, %v317_v53 }
  0xce   :  { %v234_v3 = vpop.permute.xlu1 %233  ;;  %v214_v4 = vpop.permute.xlu0 %213  ;;  %v341_v11 = vsub.f32 1.5, %v340_v6  ;;  %534 = vmatpush.msra.mxu0 %v501_v48 }
  0xcf   :  { %v325_v7 = vadd.f32 1e-05, %v321_v2  ;;  %v222_v8 = vadd.f32 %v214_v4, %v2409_v63  ;;  %v242_v12 = vadd.f32 %v234_v3, %v2407_v62 }
  0xd0   :  { %v342_v63 = vmul.f32 %v1951_v51, %v341_v11  ;;  %535 = vmatpush.msra.mxu0 %v500_v49 }
  0xd1   :  { %1952 = vrsqrt.f32 %v325_v7  ;;  %v258_v13 = vadd.f32 %v250_v52, %v222_v8  ;;  %vm353_vm8 = vweird.f32 %v325_v7 }
  0xd2   :  { %v2471_v25 = vsel %vm345_vm6, %v1951_v51, %v342_v63 }
  0xd3   :  { %450 = vrot.lane.b32.xlu2 %v2460_v9, %s2234_s21  ;;  %438 = vrot.lane.b32.xlu1 %v2460_v9, %s2235_s23 }
  0xd4   :  { %426 = vrot.lane.b32.xlu0 %v2460_v9, %s2225_s22 }
  0xd6   :  { %v282_v15 = vpop.permute.xlu1 %281  ;;  %v266_v16 = vpop.permute.xlu0 %265 }
  0xd7   :  { %v1953_v17 = vpop.eup %1952  ;;  %v290_v18 = vadd.f32 %v282_v15, %v258_v13  ;;  %v274_v19 = vadd.f32 %v266_v16, %v242_v12  ;;  %v490_v13 = vld [vmem:[#allocation5] sm:$0xff]  ;;  %v495_v15 = vld [vmem:[#allocation7] sm:$0xff] }
  0xd8   :  { %v348_v20 = vmul.f32 %v1953_v17, %v325_v7  ;;  %vm354_vm7 = vweird.f32 %v1953_v17 }
  0xd9   :  { %v2469_v21 = vmul.f32 0.03125, %v290_v18  ;;  %v306_v22 = vadd.f32 %v298_v14, %v274_v19  ;;  %vm355_vm9 = vmor %vm353_vm8, %vm354_vm7 }
  0xda   :  { %v349_v23 = vmul.f32 %v1953_v17, %v348_v20 }
  0xdb   :  { %v314_v26 = vmul.f32 0.03125, %v306_v22  ;;  %v318_v62 = vmul.f32 %v2469_v21, %v2469_v21  ;;  %452 = vrot.lane.b32.xlu2 %v2471_v25, %s2234_s21  ;;  %440 = vrot.lane.b32.xlu1 %v2471_v25, %s2235_s23 }
  0xdc   :  { %428 = vrot.lane.b32.xlu0 %v2471_v25, %s2225_s22  ;;  %v350_v28 = vmul.f32 0.5, %v349_v23 }
  0xdd   :  { %v322_v27 = vsub.f32 %v314_v26, %v318_v62 }
  0xde   :  { %v351_v32 = vsub.f32 1.5, %v350_v28 }
  0xdf   :  { %v326_v31 = vadd.f32 1e-05, %v322_v27 }
  0xe0   :  { %v352_v33 = vmul.f32 %v1953_v17, %v351_v32 }
  0xe1   :  { %1954 = vrsqrt.f32 %v326_v31  ;;  %vm363_vm11 = vweird.f32 %v326_v31 }
  0xe2   :  { %v2487_v36 = vsel %vm355_vm9, %v1953_v17, %v352_v33 }
  0xe3   :  { %401 = vrot.lane.b32.xlu2 %v2469_v21, %s2234_s21  ;;  %389 = vrot.lane.b32.xlu1 %v2469_v21, %s2235_s23 }
  0xe4   :  { %377 = vrot.lane.b32.xlu0 %v2469_v21, %s2225_s22 }
  0xe7   :  { %v1955_v29 = vpop.eup %1954 }
  0xe8   :  { %v358_v30 = vmul.f32 %v1955_v29, %v326_v31  ;;  %vm364_vm10 = vweird.f32 %v1955_v29 }
  0xe9   :  { %vm365_vm12 = vmor %vm363_vm11, %vm364_vm10 }
  0xea   :  { %v359_v35 = vmul.f32 %v1955_v29, %v358_v30 }
  0xeb   :  { %454 = vrot.lane.b32.xlu2 %v2487_v36, %s2234_s21  ;;  %442 = vrot.lane.b32.xlu1 %v2487_v36, %s2235_s23 }
  0xec   :  { %430 = vrot.lane.b32.xlu0 %v2487_v36, %s2225_s22  ;;  %v360_v37 = vmul.f32 0.5, %v359_v35 }
  0xee   :  { %v361_v38 = vsub.f32 1.5, %v360_v37 }
  0xf0   :  { %v362_v39 = vmul.f32 %v1955_v29, %v361_v38 }
  0xf2   :  { %v2495_v41 = vsel %vm365_vm12, %v1955_v29, %v362_v39 }
  0xf3   :  { %456 = vrot.lane.b32.xlu2 %v2495_v41, %s2234_s21  ;;  %444 = vrot.lane.b32.xlu1 %v2495_v41, %s2235_s23 }
  0xf4   :  { %432 = vrot.lane.b32.xlu0 %v2495_v41, %s2225_s22 }
 0x101   :  { %v396_v42 = vpop.permute.xlu2 %395 }
 0x115   :  { %v398_v46 = vpop.permute.xlu2 %397 }
 0x119   :  { %v384_v45 = vpop.permute.xlu1 %383 }
 0x11a   :  { %v372_v47 = vpop.permute.xlu0 %371 }
 0x11b   :  { %v408_v55 = vsel %vm407_vm13, %v2424_v10, %v372_v47 }
 0x11c   :  { %v413_v59 = vsel %vm412_vm14, %v408_v55, %v384_v45 }
 0x11d   :  { %v418_v61 = vsel %vm417_vm15, %v413_v59, %v396_v42 }
 0x11e   :  { %v474_v2 = vperm.slane %v418_v61, 0 }
 0x120   :  { %v478_v7 = vsub.f32 %v2331_v0, %v474_v2 }
 0x125   :  { %v400_v51 = vpop.permute.xlu2 %399 }
 0x12d   :  { %v386_v50 = vpop.permute.xlu1 %385  ;;  %v451_v60 = vpop.permute.xlu2 %450 }
 0x12e   :  { %v374_v54 = vpop.permute.xlu0 %373 }
 0x12f   :  { %v409_v53 = vsel %vm407_vm13, %v2437_v34, %v374_v54 }
 0x130   :  { %v414_v5 = vsel %vm412_vm14, %v409_v53, %v386_v50 }
 0x131   :  { %v419_v12 = vsel %vm417_vm15, %v414_v5, %v398_v46 }
 0x132   :  { %v475_v16 = vperm.slane %v419_v12, 0  ;;  %v2571_v12 = vld [vmem:[#allocation13] sm:$0xff] }
 0x134   :  { %v479_v0 = vsub.f32 %v2333_v1, %v475_v16  ;;  %v2576_v16 = vld [vmem:[#allocation13 + $0x18] sm:$0xff] }
 0x135   :  { %v453_v8 = vpop.permute.xlu2 %452 }
 0x13d   :  { %v388_v56 = vpop.permute.xlu1 %387  ;;  %v402_v23 = vpop.permute.xlu2 %401 }
 0x13e   :  { %v376_v58 = vpop.permute.xlu0 %375 }
 0x13f   :  { %v410_v62 = vsel %vm407_vm13, %v2449_v57, %v376_v58 }
 0x145   :  { %v439_v52 = vpop.permute.xlu1 %438  ;;  %v455_v35 = vpop.permute.xlu2 %454 }
 0x146   :  { %v427_v3 = vpop.permute.xlu0 %426 }
 0x147   :  { %v462_v4 = vsel %vm407_vm13, %v2460_v9, %v427_v3 }
 0x148   :  { %v466_v10 = vsel %vm412_vm14, %v462_v4, %v439_v52 }
 0x149   :  { %v470_v6 = vsel %vm417_vm15, %v466_v10, %v451_v60 }
 0x14a   :  { %v482_v11 = vperm.slane %v470_v6, 0 }
 0x14c   :  { %v486_v34 = vmul.f32 %v482_v11, %v478_v7 }
 0x14d   :  { %v441_v14 = vpop.permute.xlu1 %440 }
 0x14e   :  { %v429_v63 = vpop.permute.xlu0 %428  ;;  %v491_v17 = vmul.f32 %v490_v13, %v486_v34 }
 0x14f   :  { %v463_v9 = vsel %vm407_vm13, %v2471_v25, %v429_v63  ;;  %v415_v25 = vsel %vm412_vm14, %v410_v62, %v388_v56 }
 0x150   :  { %v467_v18 = vsel %vm412_vm14, %v463_v9, %v441_v14  ;;  %v496_v19 = vadd.f32 %v495_v15, %v491_v17  ;;  %v420_v33 = vsel %vm417_vm15, %v415_v25, %v400_v51 }
 0x151   :  { %v471_v20 = vsel %vm417_vm15, %v467_v18, %v453_v8  ;;  %v476_v30 = vperm.slane %v420_v33, 0  ;;  %v2569_v8 = vld [vmem:[#allocation11] sm:$0xff] }
 0x152   :  { %v483_v22 = vperm.slane %v471_v20, 0  ;;  %1834 = vmatmul.msk.f32.vlgmr.msra.gmra.mxu0 %vm142_vm0, %v496_v19  ;;  %v2581_v19 = vld [vmem:[#allocation13 + $0x8] sm:$0xff] }
 0x153   :  { %v480_v43 = vsub.f32 %v2347_v24, %v476_v30 }
 0x154   :  { %v487_v26 = vmul.f32 %v483_v22, %v479_v0 }
 0x155   :  { %v390_v27 = vpop.permute.xlu1 %389 }
 0x156   :  { %v378_v28 = vpop.permute.xlu0 %377  ;;  %v492_v31 = vmul.f32 %v490_v13, %v487_v26 }
 0x157   :  { %v411_v1 = vsel %vm407_vm13, %v2469_v21, %v378_v28 }
 0x158   :  { %v497_v32 = vadd.f32 %v495_v15, %v492_v31  ;;  %v416_v38 = vsel %vm412_vm14, %v411_v1, %v390_v27 }
 0x159   :  { %v421_v45 = vsel %vm417_vm15, %v416_v38, %v402_v23 }
 0x15a   :  { %1835 = vmatmul.msk.f32.gmra.mxu0 %vm142_vm0, %v497_v32  ;;  %v477_v47 = vperm.slane %v421_v45, 0 }
 0x15c   :  { %v481_v56 = vsub.f32 %v2372_v40, %v477_v47 }
 0x15d   :  { %v443_v29 = vpop.permute.xlu1 %442 }
 0x15e   :  { %v431_v37 = vpop.permute.xlu0 %430 }
 0x15f   :  { %v464_v57 = vsel %vm407_vm13, %v2487_v36, %v431_v37  ;;  %v457_v36 = vpop.permute.xlu2 %456 }
 0x160   :  { %v468_v39 = vsel %vm412_vm14, %v464_v57, %v443_v29 }
 0x161   :  { %v472_v42 = vsel %vm417_vm15, %v468_v39, %v455_v35 }
 0x162   :  { %v484_v44 = vperm.slane %v472_v42, 0 }
 0x164   :  { %v488_v46 = vmul.f32 %v484_v44, %v480_v43 }
 0x165   :  { %v445_v21 = vpop.permute.xlu1 %444 }
 0x166   :  { %v433_v48 = vpop.permute.xlu0 %432  ;;  %v493_v49 = vmul.f32 %v490_v13, %v488_v46 }
 0x167   :  { %v465_v50 = vsel %vm407_vm13, %v2495_v41, %v433_v48  ;;  %v1946_v41 = vld [vmem:[%s2832_s4] ss:$0 sm:$0xff]  ;;  %s2237_s4 = smov 88  }
 0x168   :  { %v469_v51 = vsel %vm412_vm14, %v465_v50, %v445_v21  ;;  %v498_v54 = vadd.f32 %v495_v15, %v493_v49 }
 0x169   :  { %v473_v55 = vsel %vm417_vm15, %v469_v51, %v457_v36  ;;  %v2613_v51 = vld [vmem:[#allocation13 + $0x10] sm:$0xff] }
 0x16a   :  { %v485_v24 = vperm.slane %v473_v55, 0  ;;  %1836 = vmatmul.msk.f32.gmra.mxu0 %vm142_vm0, %v498_v54 }
 0x16c   :  { %v489_v58 = vmul.f32 %v485_v24, %v481_v56 }
 0x16e   :  { %v494_v59 = vmul.f32 %v490_v13, %v489_v58 }
 0x170   :  { %v499_v60 = vadd.f32 %v495_v15, %v494_v59 }
 0x172   :  { %1837 = vmatmul.msk.f32.gmra.mxu0 %vm142_vm0, %v499_v60 }
 0x1cf   :  { %v537_v61 = vpop.f32.mrf.mxu0 }
 0x1d0   :  { %v2546_v53 = vadd.f32 %v1946_v41, %v537_v61 }
 0x1d2   :  { %555 = vrot.lane.b32.xlu1 %v2546_v53, %s2236_s3 }
 0x1d7   :  { %v540_v40 = vpop.f32.mrf.mxu0 }
 0x1d8   :  { %v2550_v52 = vadd.f32 %v1946_v41, %v540_v40 }
 0x1da   :  { %582 = vrot.lane.b32.xlu0 %v2550_v52, %s2236_s3  ;;  %v1926_v23 = vpack.i.bf16 %v2546_v53, %v2550_v52 }
 0x1e7   :  { %v543_v2 = vpop.f32.mrf.mxu0 }
 0x1e8   :  { %v2554_v3 = vadd.f32 %v1946_v41, %v543_v2 }
 0x1ef   :  { %v546_v4 = vpop.f32.mrf.mxu0 }
 0x1f0   :  { %v2556_v5 = vadd.f32 %v1946_v41, %v546_v4 }
 0x1f2   :  { %636 = vrot.lane.b32.xlu2 %v2556_v5, %s2236_s3 }
 0x244   :  { %v556_v10 = vpop.permute.xlu1 %555 }
 0x245   :  { %1838 = vmatpush.xpose.msk.msra.mxu1 %vm407_vm13, %v556_v10 }
 0x248   :  { %1839 = vmatmul.msk.f32.vlgmr.msra.gmra.mxu1 %vm407_vm13, %v2546_v53 }
 0x24c   :  { %v637_v6 = vpop.permute.xlu2 %636  ;;  %v583_v7 = vpop.permute.xlu0 %582 }
 0x24d   :  { %1840 = vmatpush.xpose.msk.msra.mxu3 %vm407_vm13, %v583_v7  ;;  %1844 = vmatpush.xpose.msk.msrb.mxu1 %vm407_vm13, %v637_v6 }
 0x250   :  { %1841 = vmatmul.msk.f32.vlgmr.msra.gmra.mxu3 %vm407_vm13, %v2550_v52  ;;  %1845 = vmatmul.msk.f32.vlgmr.msrb.gmra.mxu1 %vm407_vm13, %v2556_v5 }
 0x2c5   :  { %v578_v11 = vpop.f32.mrf.mxu1 }
 0x2c6   :  { %v579_v13 = vadd.f32 %v578_v11, %v2569_v8 }
 0x2c8   :  { %v666_v34 = vadd.f32 %v2571_v12, %v579_v13 }
 0x2ca   :  { %v670_v14 = vsel %vm407_vm13, %v666_v34, -inf }
 0x2cb   :  { %671 = vmax.xlane.f32.xlu1 %v670_v14  ;;  %v2632_v14 = vld [vmem:[#allocation11 + $0x8] sm:$0xff] }
 0x2cd   :  { %v659_v15 = vpop.f32.mrf.mxu1 }
 0x2ce   :  { %v660_v63 = vadd.f32 %v659_v15, %v2569_v8 }
 0x2d0   :  { %v669_v17 = vadd.f32 %v2576_v16, %v660_v63 }
 0x2d2   :  { %v679_v9 = vsel %vm407_vm13, %v669_v17, -inf }
 0x2d3   :  { %680 = vmax.xlane.f32.xlu2 %v679_v9  ;;  %v605_v18 = vpop.f32.mrf.mxu3 }
 0x2d4   :  { %v606_v20 = vadd.f32 %v605_v18, %v2569_v8 }
 0x2d6   :  { %v667_v0 = vadd.f32 %v2581_v19, %v606_v20 }
 0x2d8   :  { %v673_v22 = vsel %vm407_vm13, %v667_v0, -inf }
 0x2d9   :  { %674 = vmax.xlane.f32.xlu0 %v673_v22  ;;  %v1931_v22 = vpack.i.bf16 %v2554_v3, %v2556_v5 }
 0x2e4   :  { %822 = vrot.lane.b32.xlu1 %v2546_v53, %s2237_s4 }
 0x2eb   :  { %609 = vrot.lane.b32.xlu2 %v2554_v3, %s2236_s3 }
 0x2ed   :  { %1927 = vrot.lane.b32.xlu0 %v1926_v23, %s2238_s26 }
 0x33e   :  { %v672_v26 = vpop.xlane.xlu1 %671 }
 0x33f   :  { %v682_v62 = vsub.f32 %v666_v34, %v672_v26 }
 0x341   :  { %v686_v27 = vmul.f32 1.442695, %v682_v62 }
 0x343   :  { %1956 = vpow2.f32 %v686_v27 }
 0x346   :  { %v681_v28 = vpop.xlane.xlu2 %680 }
 0x347   :  { %v685_v31 = vsub.f32 %v669_v17, %v681_v28 }
 0x349   :  { %v1957_v25 = vpop.eup %1956  ;;  %v692_v32 = vmul.f32 1.442695, %v685_v31 }
 0x34a   :  { %v694_v33 = vsel %vm407_vm13, %v1957_v25, 0.0 }
 0x34b   :  { %1958 = vpow2.f32 %v692_v32  ;;  %695 = vadd.xlane.f32.xlu1 %v694_v33 }
 0x34c   :  { %v675_v1 = vpop.xlane.xlu0 %674 }
 0x34d   :  { %v683_v29 = vsub.f32 %v667_v0, %v675_v1 }
 0x34e   :  { %v610_v30 = vpop.permute.xlu2 %609 }
 0x34f   :  { %v688_v35 = vmul.f32 1.442695, %v683_v29  ;;  %1842 = vmatpush.xpose.msk.msrb.mxu3 %vm407_vm13, %v610_v30 }
 0x351   :  { %v1959_v37 = vpop.eup %1958  ;;  %1960 = vpow2.f32 %v688_v35 }
 0x352   :  { %1843 = vmatmul.msk.f32.vlgmr.msrb.gmra.mxu3 %vm407_vm13, %v2554_v3  ;;  %v703_v57 = vsel %vm407_vm13, %v1959_v37, 0.0 }
 0x353   :  { %704 = vadd.xlane.f32.xlu2 %v703_v57 }
 0x356   :  { %v823_v45 = vpop.permute.xlu1 %822 }
 0x357   :  { %v1961_v38 = vpop.eup %1960 }
 0x358   :  { %v697_v39 = vsel %vm407_vm13, %v1961_v38, 0.0 }
 0x359   :  { %698 = vadd.xlane.f32.xlu0 %v697_v39 }
 0x35f   :  { %v1928_v42 = vpop.permute.xlu0 %1927 }
 0x360   :  { %v1929_v43 = vunpack.i.l.bf16 %v1928_v42  ;;  %v1930_v44 = vunpack.i.h.bf16 %v1928_v42 }
 0x362   :  { %735 = vmatpush.msra.mxu2 %v1930_v44  ;;  %761 = vmatpush.msra.mxu3 %v1929_v43 }
 0x364   :  { %1850 = vmatpush.xpose.msk.msrb.mxu3 %vm407_vm13, %v823_v45  ;;  %906 = vrot.lane.b32.xlu1 %v2556_v5, %s2237_s4 }
 0x36c   :  { %904 = vrot.lane.b32.xlu1 %v2556_v5, %s2232_s8 }
 0x36d   :  { %820 = vrot.lane.b32.xlu0 %v2546_v53, %s2232_s8 }
 0x374   :  { %876 = vrot.lane.b32.xlu1 %v2554_v3, %s2232_s8 }
 0x375   :  { %792 = vrot.lane.b32.xlu0 %v2556_v5, %s2238_s26 }
 0x37d   :  { %878 = vrot.lane.b32.xlu0 %v2554_v3, %s2237_s4 }
 0x3be   :  { %v696_v46 = vpop.xlane.xlu1 %695 }
 0x3bf   :  { %1962 = vrcp.f32 %v696_v46 }
 0x3c5   :  { %v1963_v21 = vpop.eup %1962 }
 0x3c6   :  { %v710_v47 = vmul.f32 %v1963_v21, %v1957_v25  ;;  %v705_v58 = vpop.xlane.xlu2 %704 }
 0x3c8   :  { %1846 = vmatmul.msk.f32.vlgmr.msra.gmra.mxu2 %vm407_vm13, %v710_v47 }
 0x3cc   :  { %v699_v48 = vpop.xlane.xlu0 %698 }
 0x3cd   :  { %1964 = vrcp.f32 %v699_v48 }
 0x3ce   :  { %1966 = vrcp.f32 %v705_v58 }
 0x3d3   :  { %v1965_v49 = vpop.eup %1964 }
 0x3d4   :  { %v711_v50 = vmul.f32 %v1965_v49, %v1961_v38  ;;  %v1967_v60 = vpop.eup %1966 }
 0x3d5   :  { %v632_v36 = vpop.f32.mrf.mxu3  ;;  %v713_v40 = vmul.f32 %v1967_v60, %v1959_v37 }
 0x3d6   :  { %v633_v54 = vadd.f32 %v632_v36, %v2569_v8  ;;  %v907_v55 = vpop.permute.xlu1 %906  ;;  %1847 = vmatmul.msk.f32.vlgmr.msra.gmra.mxu3 %vm407_vm13, %v711_v50 }
 0x3d7   :  { %1856 = vmatpush.xpose.msk.msra.mxu3 %vm407_vm13, %v907_v55 }
 0x3d8   :  { %v668_v56 = vadd.f32 %v2613_v51, %v633_v54 }
 0x3da   :  { %v676_v24 = vsel %vm407_vm13, %v668_v56, -inf }
 0x3db   :  { %677 = vmax.xlane.f32.xlu0 %v676_v24 }
 0x3de   :  { %v905_v41 = vpop.permute.xlu1 %904 }
 0x3df   :  { %v821_v59 = vpop.permute.xlu0 %820 }
 0x3e0   :  { %1851 = vmatmul.msk.f32.vlgmr.msrb.gmra.mxu3 %vm407_vm13, %v821_v59 }
 0x3e6   :  { %v877_v4 = vpop.permute.xlu1 %876 }
 0x3e7   :  { %v793_v61 = vpop.permute.xlu0 %792 }
 0x3e8   :  { %813 = vmatpush.msrb.mxu2 %v793_v61  ;;  %1857 = vmatmul.msk.f32.vlgmr.msra.gmra.mxu3 %vm407_vm13, %v905_v41 }
 0x3e9   :  { %1849 = vmatmul.msk.f32.vlgmr.msrb.gmra.mxu2 %vm407_vm13, %v713_v40 }
 0x3ef   :  { %850 = vrot.lane.b32.xlu0 %v2550_v52, %s2237_s4  ;;  %v879_v2 = vpop.permute.xlu0 %878 }
 0x3f0   :  { %1854 = vmatpush.xpose.msk.msra.mxu2 %vm407_vm13, %v879_v2 }
 0x3f3   :  { %1855 = vmatmul.msk.f32.vlgmr.msra.gmra.mxu2 %vm407_vm13, %v877_v4 }
 0x44b   :  { %v2639_v18 = vpop.f32.mrf.mxu2 }
 0x44e   :  { %v678_v10 = vpop.xlane.xlu0 %677 }
 0x44f   :  { %v684_v6 = vsub.f32 %v668_v56, %v678_v10 }
 0x451   :  { %v690_v7 = vmul.f32 1.442695, %v684_v6 }
 0x453   :  { %1968 = vpow2.f32 %v690_v7  ;;  %v1171_v7 = vld [vmem:[#allocation11 + $0x10] sm:$0xff] }
 0x459   :  { %v1969_v8 = vpop.eup %1968  ;;  %v2628_v13 = vpop.f32.mrf.mxu3 }
 0x45a   :  { %v700_v11 = vsel %vm407_vm13, %v1969_v8, 0.0 }
 0x45b   :  { %701 = vadd.xlane.f32.xlu2 %v700_v11 }
 0x461   :  { %v851_v32 = vpop.permute.xlu0 %850 }
 0x463   :  { %v2630_v34 = vpop.f32.mrf.mxu3 }
 0x46b   :  { %v929_v15 = vpop.f32.mrf.mxu3 }
 0x46c   :  { %v930_v63 = vadd.f32 %v929_v15, %v2632_v14  ;;  %v2641_v20 = vpop.f32.mrf.mxu2 }
 0x46e   :  { %v939_v17 = vadd.f32 %v930_v63, %v2576_v16 }
 0x470   :  { %v949_v9 = vsel %vm407_vm13, %v939_v17, -inf }
 0x471   :  { %950 = vmax.xlane.f32.xlu1 %v949_v9 }
 0x473   :  { %766 = vrot.lane.b32.xlu2 %v2554_v3, %s2238_s26 }
 0x476   :  { %v901_v0 = vpop.f32.mrf.mxu2 }
 0x477   :  { %v902_v23 = vadd.f32 %v901_v0, %v2632_v14 }
 0x479   :  { %v938_v26 = vadd.f32 %v902_v23, %v2613_v51 }
 0x47b   :  { %v946_v62 = vsel %vm407_vm13, %v938_v26, -inf }
 0x48a   :  { %848 = vrot.lane.b32.xlu1 %v2550_v52, %s2232_s8 }
 0x492   :  { %1932 = vrot.lane.b32.xlu1 %v1931_v22, %s2239_s7 }
 0x49a   :  { %1202 = vrot.lane.b32.xlu1 %v2550_v52, %s2240_s27 }
 0x49c   :  { %947 = vmax.xlane.f32.xlu2 %v946_v62 }
 0x4a2   :  { %1200 = vrot.lane.b32.xlu1 %v2550_v52, %s2231_s5 }
 0x4aa   :  { %1258 = vrot.lane.b32.xlu1 %v2556_v5, %s2240_s27 }
 0x4b2   :  { %1256 = vrot.lane.b32.xlu1 %v2556_v5, %s2231_s5 }
 0x4b4   :  { %1174 = vrot.lane.b32.xlu2 %v2546_v53, %s2240_s27 }
 0x4ba   :  { %1230 = vrot.lane.b32.xlu1 %v2554_v3, %s2240_s27 }
 0x4ce   :  { %v702_v27 = vpop.xlane.xlu2 %701 }
 0x4cf   :  { %1970 = vrcp.f32 %v702_v27 }
 0x4d5   :  { %v1971_v28 = vpop.eup %1970 }
 0x4d6   :  { %v712_v31 = vmul.f32 %v1971_v28, %v1969_v8  ;;  %v767_v25 = vpop.permute.xlu2 %766 }
 0x4d7   :  { %787 = vmatpush.msra.mxu1 %v767_v25 }
 0x4d8   :  { %1848 = vmatmul.msk.f32.vlgmr.msra.gmra.mxu1 %vm407_vm13, %v712_v31 }
 0x4d9   :  { %1852 = vmatpush.xpose.msk.msrb.mxu1 %vm407_vm13, %v851_v32 }
 0x4e4   :  { %v951_v33 = vpop.xlane.xlu1 %950 }
 0x4e5   :  { %v955_v1 = vsub.f32 %v939_v17, %v951_v33 }
 0x4e7   :  { %v962_v29 = vmul.f32 1.442695, %v955_v1 }
 0x4e9   :  { %1972 = vpow2.f32 %v962_v29 }
 0x4ef   :  { %v1973_v30 = vpop.eup %1972 }
 0x4f0   :  { %v973_v35 = vsel %vm407_vm13, %v1973_v30, 0.0 }
 0x4f1   :  { %974 = vadd.xlane.f32.xlu2 %v973_v35 }
 0x4fc   :  { %v849_v37 = vpop.permute.xlu1 %848 }
 0x4fd   :  { %1853 = vmatmul.msk.f32.vlgmr.msrb.gmra.mxu1 %vm407_vm13, %v849_v37 }
 0x504   :  { %v1933_v57 = vpop.permute.xlu1 %1932 }
 0x505   :  { %v1935_v38 = vunpack.i.h.bf16 %v1933_v57  ;;  %v1934_v39 = vunpack.i.l.bf16 %v1933_v57 }
 0x507   :  { %1057 = vmatpush.msrb.mxu3 %v1935_v38  ;;  %1083 = vmatpush.msrb.mxu0 %v1934_v39  ;;  %v549_v38 = vld [vmem:[#allocation10] sm:$0xff] }
 0x509   :  { %1228 = vrot.lane.b32.xlu2 %v2554_v3, %s2231_s5 }
 0x50c   :  { %v1203_v42 = vpop.permute.xlu1 %1202 }
 0x50d   :  { %1872 = vmatpush.xpose.msk.msra.mxu0 %vm407_vm13, %v1203_v42 }
 0x50f   :  { %v948_v43 = vpop.xlane.xlu2 %947 }
 0x510   :  { %v954_v44 = vsub.f32 %v938_v26, %v948_v43 }
 0x512   :  { %v960_v45 = vmul.f32 1.442695, %v954_v44 }
 0x514   :  { %1974 = vpow2.f32 %v960_v45  ;;  %v1201_v48 = vpop.permute.xlu1 %1200 }
 0x517   :  { %v1175_v46 = vpop.permute.xlu2 %1174 }
 0x518   :  { %1870 = vmatpush.xpose.msk.msra.mxu3 %vm407_vm13, %v1175_v46 }
 0x51a   :  { %v1975_v21 = vpop.eup %1974 }
 0x51b   :  { %v970_v47 = vsel %vm407_vm13, %v1975_v21, 0.0 }
 0x51c   :  { %971 = vadd.xlane.f32.xlu0 %v970_v47  ;;  %v1259_v54 = vpop.permute.xlu1 %1258 }
 0x524   :  { %v1257_v58 = vpop.permute.xlu1 %1256 }
 0x52c   :  { %v1231_v2 = vpop.permute.xlu1 %1230 }
 0x530   :  { %1172 = vrot.lane.b32.xlu0 %v2546_v53, %s2231_s5 }
 0x555   :  { %v2672_v55 = vpop.f32.mrf.mxu1 }
 0x564   :  { %v975_v49 = vpop.xlane.xlu2 %974 }
 0x565   :  { %1976 = vrcp.f32 %v975_v49 }
 0x56b   :  { %v1977_v50 = vpop.eup %1976 }
 0x56c   :  { %v983_v36 = vmul.f32 %v1977_v50, %v1973_v30  ;;  %v1229_v10 = vpop.permute.xlu2 %1228 }
 0x56e   :  { %1861 = vmatmul.msk.f32.vlgmr.msrb.gmra.mxu0 %vm407_vm13, %v983_v36 }
 0x56f   :  { %1876 = vmatpush.xpose.msk.msrb.mxu0 %vm407_vm13, %v1259_v54 }
 0x576   :  { %1873 = vmatmul.msk.f32.vlgmr.msra.gmra.mxu0 %vm407_vm13, %v1201_v48 }
 0x57a   :  { %v873_v56 = vpop.f32.mrf.mxu1 }
 0x57b   :  { %v874_v24 = vadd.f32 %v873_v56, %v2632_v14  ;;  %v1936_v56 = vpack.i.bf16 %v2556_v5, %v2550_v52 }
 0x57d   :  { %v937_v59 = vadd.f32 %v874_v24, %v2581_v19 }
 0x57e   :  { %1877 = vmatmul.msk.f32.vlgmr.msrb.gmra.mxu0 %vm407_vm13, %v1257_v58 }
 0x57f   :  { %v943_v60 = vsel %vm407_vm13, %v937_v59, -inf }
 0x580   :  { %944 = vmax.xlane.f32.xlu1 %v943_v60 }
 0x58f   :  { %v972_v41 = vpop.xlane.xlu0 %971 }
 0x590   :  { %1978 = vrcp.f32 %v972_v41 }
 0x596   :  { %v1979_v61 = vpop.eup %1978 }
 0x597   :  { %v982_v40 = vmul.f32 %v1979_v61, %v1975_v21 }
 0x599   :  { %1010 = vrot.lane.b32.xlu1 %v2550_v52, %s2239_s7  ;;  %1860 = vmatmul.msk.f32.vlgmr.msrb.gmra.mxu3 %vm407_vm13, %v982_v40 }
 0x59a   :  { %1874 = vmatpush.xpose.msk.msrb.mxu3 %vm407_vm13, %v1231_v2 }
 0x5a2   :  { %v1173_v4 = vpop.permute.xlu0 %1172 }
 0x5a3   :  { %1871 = vmatmul.msk.f32.vlgmr.msra.gmra.mxu3 %vm407_vm13, %v1173_v4 }
 0x5ab   :  { %1875 = vmatmul.msk.f32.vlgmr.msrb.gmra.mxu3 %vm407_vm13, %v1229_v10 }
 0x5eb   :  { %v2685_v6 = vpop.f32.mrf.mxu0 }
 0x5f3   :  { %v945_v8 = vpop.xlane.xlu1 %944  ;;  %v1225_v11 = vpop.f32.mrf.mxu0 }
 0x5f4   :  { %v953_v15 = vsub.f32 %v937_v59, %v945_v8  ;;  %v1226_v63 = vadd.f32 %v1225_v11, %v1171_v7  ;;  %v846_v11 = vadd.f32 %v2630_v34, %v2632_v14 }
 0x5f6   :  { %v958_v17 = vmul.f32 1.442695, %v953_v15  ;;  %v1289_v9 = vadd.f32 %v1226_v63, %v2581_v19  ;;  %v936_v63 = vadd.f32 %v846_v11, %v2571_v12 }
 0x5f8   :  { %1980 = vpow2.f32 %v958_v17  ;;  %v1295_v0 = vsel %vm407_vm13, %v1289_v9, -inf  ;;  %v940_v17 = vsel %vm407_vm13, %v936_v63, -inf }
 0x5f9   :  { %1296 = vmax.xlane.f32.xlu0 %v1295_v0 }
 0x5fb   :  { %v1281_v22 = vpop.f32.mrf.mxu0 }
 0x5fc   :  { %v1282_v23 = vadd.f32 %v1281_v22, %v1171_v7 }
 0x5fe   :  { %v1981_v26 = vpop.eup %1980  ;;  %v1291_v62 = vadd.f32 %v1282_v23, %v2576_v16 }
 0x5ff   :  { %v967_v27 = vsel %vm407_vm13, %v1981_v26, 0.0 }
 0x600   :  { %v1301_v28 = vsel %vm407_vm13, %v1291_v62, -inf }
 0x601   :  { %1302 = vmax.xlane.f32.xlu2 %v1301_v28  ;;  %968 = vadd.xlane.f32.xlu0 %v967_v27 }
 0x60b   :  { %v1011_v31 = vpop.permute.xlu1 %1010 }
 0x60c   :  { %1031 = vmatpush.msrb.mxu2 %v1011_v31 }
 0x60e   :  { %1156 = vmatpush.msra.mxu2 %v549_v38 }
 0x61c   :  { %v2692_v25 = vpop.f32.mrf.mxu3 }
 0x626   :  { %v1197_v32 = vpop.f32.mrf.mxu3 }
 0x627   :  { %v1198_v33 = vadd.f32 %v1197_v32, %v1171_v7 }
 0x629   :  { %v1288_v1 = vadd.f32 %v1198_v33, %v2571_v12 }
 0x62b   :  { %v1292_v29 = vsel %vm407_vm13, %v1288_v1, -inf }
 0x62c   :  { %1293 = vmax.xlane.f32.xlu1 %v1292_v29 }
 0x62e   :  { %v1253_v30 = vpop.f32.mrf.mxu3 }
 0x62f   :  { %v1254_v35 = vadd.f32 %v1253_v30, %v1171_v7 }
 0x631   :  { %v1290_v37 = vadd.f32 %v1254_v35, %v2613_v51 }
 0x633   :  { %v1298_v57 = vsel %vm407_vm13, %v1290_v37, -inf }
 0x634   :  { %1299 = vmax.xlane.f32.xlu2 %v1298_v57 }
 0x645   :  { %1487 = vrot.lane.b32.xlu1 %v2546_v53, %s2233_s20 }
 0x64c   :  { %1489 = vrot.lane.b32.xlu2 %v2546_v53, %s2241_s28 }
 0x64d   :  { %1336 = vrot.lane.b32.xlu1 %v2546_v53, %s2242_s29 }
 0x655   :  { %1545 = vrot.lane.b32.xlu1 %v2554_v3, %s2241_s28 }
 0x65d   :  { %1543 = vrot.lane.b32.xlu1 %v2554_v3, %s2233_s20 }
 0x665   :  { %1388 = vrot.lane.b32.xlu1 %v2554_v3, %s2242_s29 }
 0x66c   :  { %v1297_v39 = vpop.xlane.xlu0 %1296 }
 0x66d   :  { %v1305_v42 = vsub.f32 %v1289_v9, %v1297_v39  ;;  %1515 = vrot.lane.b32.xlu1 %v2550_v52, %s2233_s20 }
 0x66f   :  { %v1310_v43 = vmul.f32 1.442695, %v1305_v42 }
 0x671   :  { %1982 = vpow2.f32 %v1310_v43  ;;  %v1486_v43 = vld [vmem:[#allocation11 + $0x18] sm:$0xff] }
 0x674   :  { %v1303_v44 = vpop.xlane.xlu2 %1302  ;;  %v969_v45 = vpop.xlane.xlu0 %968 }
 0x675   :  { %v1307_v46 = vsub.f32 %v1291_v62, %v1303_v44  ;;  %1984 = vrcp.f32 %v969_v45 }
 0x677   :  { %v1983_v21 = vpop.eup %1982  ;;  %v1314_v47 = vmul.f32 1.442695, %v1307_v46 }
 0x678   :  { %v1319_v48 = vsel %vm407_vm13, %v1983_v21, 0.0 }
 0x679   :  { %1986 = vpow2.f32 %v1314_v47  ;;  %1320 = vadd.xlane.f32.xlu0 %v1319_v48  ;;  %v1941_v48 = vpack.i.bf16 %v2554_v3, %v2546_v53 }
 0x67b   :  { %v1985_v49 = vpop.eup %1984 }
 0x67c   :  { %v981_v50 = vmul.f32 %v1985_v49, %v1981_v26 }
 0x67e   :  { %1859 = vmatmul.msk.f32.vlgmr.msrb.gmra.mxu2 %vm407_vm13, %v981_v50 }
 0x67f   :  { %v1987_v36 = vpop.eup %1986 }
 0x680   :  { %v1325_v54 = vsel %vm407_vm13, %v1987_v36, 0.0 }
 0x681   :  { %1326 = vadd.xlane.f32.xlu2 %v1325_v54 }
 0x686   :  { %1866 = vmatmul.msk.f32.vlgmr.msra.gmra.mxu2 %vm407_vm13, %v2639_v18 }
 0x68d   :  { %1937 = vrot.lane.b32.xlu0 %v1936_v56, %s2242_s29 }
 0x68e   :  { %1867 = vmatmul.msk.f32.gmra.mxu2 %vm407_vm13, %v2628_v13 }
 0x696   :  { %1868 = vmatmul.msk.f32.gmra.mxu2 %vm407_vm13, %v2672_v55 }
 0x69e   :  { %1869 = vmatmul.msk.f32.gmra.mxu2 %vm407_vm13, %v2641_v20 }
 0x69f   :  { %v1294_v24 = vpop.xlane.xlu1 %1293 }
 0x6a0   :  { %v1304_v58 = vsub.f32 %v1288_v1, %v1294_v24 }
 0x6a2   :  { %v1308_v59 = vmul.f32 1.442695, %v1304_v58 }
 0x6a4   :  { %1988 = vpow2.f32 %v1308_v59 }
 0x6a7   :  { %v1300_v60 = vpop.xlane.xlu2 %1299 }
 0x6a8   :  { %v1306_v41 = vsub.f32 %v1290_v37, %v1300_v60 }
 0x6aa   :  { %v1989_v18 = vpop.eup %1988  ;;  %v1312_v61 = vmul.f32 1.442695, %v1306_v41 }
 0x6ab   :  { %v1316_v40 = vsel %vm407_vm13, %v1989_v18, 0.0 }
 0x6ac   :  { %1317 = vadd.xlane.f32.xlu2 %v1316_v40  ;;  %1990 = vpow2.f32 %v1312_v61 }
 0x6af   :  { %v1490_v2 = vpop.permute.xlu2 %1489 }
 0x6b0   :  { %1886 = vmatpush.xpose.msk.msrb.mxu2 %vm407_vm13, %v1490_v2 }
 0x6b2   :  { %v1991_v13 = vpop.eup %1990 }
 0x6b3   :  { %v1322_v55 = vsel %vm407_vm13, %v1991_v13, 0.0 }
 0x6b7   :  { %v1488_v4 = vpop.permute.xlu1 %1487  ;;  %1323 = vadd.xlane.f32.xlu0 %v1322_v55 }
 0x6b8   :  { %1887 = vmatmul.msk.f32.vlgmr.msrb.gmra.mxu2 %vm407_vm13, %v1488_v4 }
 0x6bf   :  { %v1337_v20 = vpop.permute.xlu1 %1336 }
 0x6c0   :  { %1357 = vmatpush.msra.mxu3 %v1337_v20 }
 0x6c4   :  { %1573 = vrot.lane.b32.xlu2 %v2556_v5, %s2241_s28 }
 0x6c7   :  { %v1546_v10 = vpop.permute.xlu1 %1545 }
 0x6cc   :  { %1571 = vrot.lane.b32.xlu2 %v2556_v5, %s2233_s20 }
 0x6cf   :  { %v1544_v7 = vpop.permute.xlu1 %1543 }
 0x6d4   :  { %1517 = vrot.lane.b32.xlu2 %v2550_v52, %s2241_s28 }
 0x6d7   :  { %v1389_v8 = vpop.permute.xlu1 %1388 }
 0x6d8   :  { %1409 = vmatpush.msrb.mxu3 %v1389_v8 }
 0x6df   :  { %v1516_v44 = vpop.permute.xlu1 %1515 }
 0x6ec   :  { %v1321_v15 = vpop.xlane.xlu0 %1320 }
 0x6ed   :  { %1992 = vrcp.f32 %v1321_v15 }
 0x6f3   :  { %v1993_v0 = vpop.eup %1992 }
 0x6f4   :  { %v1327_v9 = vpop.xlane.xlu2 %1326  ;;  %v1333_v62 = vmul.f32 %v1993_v0, %v1983_v21 }
 0x6f5   :  { %1994 = vrcp.f32 %v1327_v9 }
 0x6fb   :  { %v1995_v34 = vpop.eup %1994 }
 0x6fc   :  { %v1335_v14 = vmul.f32 %v1995_v34, %v1987_v36 }
 0x6fd   :  { %941 = vmax.xlane.f32.xlu2 %v940_v17 }
 0x6ff   :  { %v1938_v22 = vpop.permute.xlu0 %1937 }
 0x700   :  { %v1940_v23 = vunpack.i.h.bf16 %v1938_v22  ;;  %v1939_v26 = vunpack.i.l.bf16 %v1938_v22 }
 0x701   :  { %v2739_v27 = vpop.f32.mrf.mxu2 }
 0x702   :  { %1383 = vmatpush.msra.mxu0 %v1939_v26 }
 0x703   :  { %1879 = vmatmul.msk.f32.vlgmr.msra.gmra.mxu0 %vm407_vm13, %v1333_v62 }
 0x704   :  { %1435 = vmatpush.msrb.mxu0 %v1940_v23 }
 0x706   :  { %1890 = vmatpush.xpose.msk.msra.mxu0 %vm407_vm13, %v1546_v10 }
 0x709   :  { %v2743_v28 = vpop.f32.mrf.mxu2 }
 0x70b   :  { %1881 = vmatmul.msk.f32.vlgmr.msrb.gmra.mxu0 %vm407_vm13, %v1335_v14 }
 0x711   :  { %v2745_v31 = vpop.f32.mrf.mxu2 }
 0x713   :  { %1891 = vmatmul.msk.f32.vlgmr.msra.gmra.mxu0 %vm407_vm13, %v1544_v7 }
 0x719   :  { %v2748_v30 = vpop.f32.mrf.mxu2 }
 0x71f   :  { %v1318_v32 = vpop.xlane.xlu2 %1317 }
 0x720   :  { %1996 = vrcp.f32 %v1318_v32 }
 0x721   :  { %v2752_v39 = vpop.f32.mrf.mxu2 }
 0x726   :  { %v1997_v33 = vpop.eup %1996 }
 0x727   :  { %v1332_v1 = vmul.f32 %v1997_v33, %v1989_v18  ;;  %v1574_v29 = vpop.permute.xlu2 %1573 }
 0x728   :  { %1892 = vmatpush.xpose.msk.msra.mxu2 %vm407_vm13, %v1574_v29 }
 0x729   :  { %1878 = vmatmul.msk.f32.vlgmr.msra.gmra.mxu3 %vm407_vm13, %v1332_v1 }
 0x72a   :  { %v1324_v35 = vpop.xlane.xlu0 %1323 }
 0x72b   :  { %1998 = vrcp.f32 %v1324_v35 }
 0x72f   :  { %v1572_v37 = vpop.permute.xlu2 %1571 }
 0x730   :  { %1893 = vmatmul.msk.f32.vlgmr.msra.gmra.mxu2 %vm407_vm13, %v1572_v37 }
 0x731   :  { %v1999_v57 = vpop.eup %1998 }
 0x732   :  { %v1334_v38 = vmul.f32 %v1999_v57, %v1991_v13 }
 0x734   :  { %1880 = vmatmul.msk.f32.vlgmr.msrb.gmra.mxu3 %vm407_vm13, %v1334_v38 }
 0x737   :  { %v1518_v42 = vpop.permute.xlu2 %1517 }
 0x738   :  { %1888 = vmatpush.xpose.msk.msra.mxu3 %vm407_vm13, %v1518_v42 }
 0x73b   :  { %v1512_v45 = vpop.f32.mrf.mxu2 }
 0x73c   :  { %v1513_v46 = vadd.f32 %v1512_v45, %v1486_v43  ;;  %1889 = vmatmul.msk.f32.vlgmr.msra.gmra.mxu3 %vm407_vm13, %v1516_v44 }
 0x73e   :  { %v1603_v21 = vadd.f32 %v1513_v46, %v2571_v12 }
 0x740   :  { %v1607_v47 = vsel %vm407_vm13, %v1603_v21, -inf }
 0x741   :  { %1608 = vmax.xlane.f32.xlu1 %v1607_v47 }
 0x75a   :  { %1942 = vrot.lane.b32.xlu1 %v1941_v48, %s2243_s30 }
 0x770   :  { %v942_v50 = vpop.xlane.xlu2 %941 }
 0x771   :  { %v952_v36 = vsub.f32 %v936_v63, %v942_v50  ;;  %v550_v50 = vld [vmem:[#allocation10 + $0x8] sm:$0xff] }
 0x773   :  { %v956_v56 = vmul.f32 1.442695, %v952_v36 }
 0x775   :  { %2000 = vpow2.f32 %v956_v56 }
 0x77b   :  { %v2001_v40 = vpop.eup %2000 }
 0x77c   :  { %v964_v20 = vsel %vm407_vm13, %v2001_v40, 0.0 }
 0x780   :  { %v2762_v49 = vpop.f32.mrf.mxu0 }
 0x788   :  { %v2764_v54 = vpop.f32.mrf.mxu0 }
 0x790   :  { %v1568_v2 = vpop.f32.mrf.mxu0 }
 0x791   :  { %v1569_v55 = vadd.f32 %v1568_v2, %v1486_v43 }
 0x7ac   :  { %v2766_v24 = vpop.f32.mrf.mxu3 }
 0x7b3   :  { %v1596_v58 = vpop.f32.mrf.mxu2 }
 0x7b4   :  { %v1597_v12 = vadd.f32 %v1596_v58, %v1486_v43  ;;  %v1609_v59 = vpop.xlane.xlu1 %1608 }
 0x7b5   :  { %v1619_v60 = vsub.f32 %v1603_v21, %v1609_v59 }
 0x7b6   :  { %v1606_v41 = vadd.f32 %v1597_v12, %v2576_v16  ;;  %v1605_v16 = vadd.f32 %v1569_v55, %v2613_v51 }
 0x7b7   :  { %v1623_v3 = vmul.f32 1.442695, %v1619_v60  ;;  %v2770_v61 = vpop.f32.mrf.mxu3 }
 0x7b8   :  { %v1616_v18 = vsel %vm407_vm13, %v1606_v41, -inf  ;;  %v1613_v8 = vsel %vm407_vm13, %v1605_v16, -inf }
 0x7b9   :  { %2002 = vpow2.f32 %v1623_v3  ;;  %1617 = vmax.xlane.f32.xlu0 %v1616_v18 }
 0x7bf   :  { %v2003_v13 = vpop.eup %2002  ;;  %v1540_v10 = vpop.f32.mrf.mxu3 }
 0x7c0   :  { %v1631_v4 = vsel %vm407_vm13, %v2003_v13, 0.0  ;;  %v1541_v7 = vadd.f32 %v1540_v10, %v1486_v43 }
 0x7c1   :  { %1632 = vadd.xlane.f32.xlu2 %v1631_v4  ;;  %965 = vadd.xlane.f32.xlu0 %v964_v20 }
 0x7c2   :  { %v1604_v15 = vadd.f32 %v1541_v7, %v2581_v19 }
 0x7c4   :  { %v1610_v9 = vsel %vm407_vm13, %v1604_v15, -inf }
 0x7c9   :  { %1614 = vmax.xlane.f32.xlu0 %v1613_v8 }
 0x7cc   :  { %v1943_v11 = vpop.permute.xlu1 %1942 }
 0x7cd   :  { %v1945_v63 = vunpack.i.h.bf16 %v1943_v11  ;;  %v1944_v17 = vunpack.i.l.bf16 %v1943_v11 }
 0x7cf   :  { %1672 = vmatpush.msrb.mxu3 %v1944_v17  ;;  %1724 = vmatpush.msrb.mxu2 %v1945_v63 }
 0x7d1   :  { %1611 = vmax.xlane.f32.xlu0 %v1610_v9 }
 0x7e5   :  { %984 = vrot.lane.b32.xlu0 %v2546_v53, %s2239_s7 }
 0x82c   :  { %v1618_v0 = vpop.xlane.xlu0 %1617 }
 0x82d   :  { %v1622_v51 = vsub.f32 %v1606_v41, %v1618_v0 }
 0x82f   :  { %v1629_v22 = vmul.f32 1.442695, %v1622_v51 }
 0x831   :  { %2004 = vpow2.f32 %v1629_v22 }
 0x834   :  { %v966_v23 = vpop.xlane.xlu0 %965  ;;  %v1633_v26 = vpop.xlane.xlu2 %1632 }
 0x835   :  { %2006 = vrcp.f32 %v1633_v26 }
 0x837   :  { %v2005_v62 = vpop.eup %2004 }
 0x838   :  { %v1640_v19 = vsel %vm407_vm13, %v2005_v62, 0.0 }
 0x839   :  { %1641 = vadd.xlane.f32.xlu2 %v1640_v19 }
 0x83b   :  { %v2007_v34 = vpop.eup %2006 }
 0x83c   :  { %v1615_v14 = vpop.xlane.xlu0 %1614  ;;  %v1647_v32 = vmul.f32 %v2007_v34, %v2003_v13 }
 0x83d   :  { %v1621_v33 = vsub.f32 %v1605_v16, %v1615_v14 }
 0x83e   :  { %1894 = vmatmul.msk.f32.vlgmr.msrb.gmra.mxu3 %vm407_vm13, %v1647_v32 }
 0x83f   :  { %v1627_v1 = vmul.f32 1.442695, %v1621_v33 }
 0x841   :  { %2008 = vpow2.f32 %v1627_v1 }
 0x844   :  { %v1612_v53 = vpop.xlane.xlu0 %1611 }
 0x845   :  { %v1620_v29 = vsub.f32 %v1604_v15, %v1612_v53 }
 0x847   :  { %v2009_v35 = vpop.eup %2008  ;;  %v1625_v37 = vmul.f32 1.442695, %v1620_v29 }
 0x848   :  { %v1637_v57 = vsel %vm407_vm13, %v2009_v35, 0.0 }
 0x849   :  { %2010 = vpow2.f32 %v1625_v37  ;;  %1638 = vadd.xlane.f32.xlu1 %v1637_v57 }
 0x84a   :  { %2012 = vrcp.f32 %v966_v23 }
 0x84f   :  { %v2011_v38 = vpop.eup %2010 }
 0x850   :  { %v1634_v42 = vsel %vm407_vm13, %v2011_v38, 0.0  ;;  %v2013_v43 = vpop.eup %2012 }
 0x851   :  { %1729 = vrot.lane.b32.xlu2 %v2556_v5, %s2243_s30  ;;  %1635 = vadd.xlane.f32.xlu0 %v1634_v42  ;;  %v980_v44 = vmul.f32 %v2013_v43, %v2001_v40  ;;  %v552_v5 = vld [vmem:[#allocation10 + $0x18] sm:$0xff] }
 0x852   :  { %1902 = vmatpush.msra.mxu2 %v552_v5 }
 0x857   :  { %v985_v45 = vpop.permute.xlu0 %984 }
 0x858   :  { %1005 = vmatpush.msra.mxu1 %v985_v45 }
 0x859   :  { %1858 = vmatmul.msk.f32.vlgmr.msra.gmra.mxu1 %vm407_vm13, %v980_v44 }
 0x85a   :  { %1115 = vmatpush.msrb.mxu1 %v550_v50 }
 0x862   :  { %1677 = vrot.lane.b32.xlu1 %v2550_v52, %s2243_s30  ;;  %v551_v52 = vld [vmem:[#allocation10 + $0x10] sm:$0xff] }
 0x863   :  { %1467 = vmatpush.msra.mxu1 %v551_v52 }
 0x8ac   :  { %v1642_v46 = vpop.xlane.xlu2 %1641 }
 0x8ad   :  { %2014 = vrcp.f32 %v1642_v46 }
 0x8b3   :  { %v2015_v21 = vpop.eup %2014 }
 0x8b4   :  { %v1650_v47 = vmul.f32 %v2015_v21, %v2005_v62  ;;  %v1730_v48 = vpop.permute.xlu2 %1729 }
 0x8b5   :  { %1750 = vmatpush.msra.mxu3 %v1730_v48 }
 0x8b6   :  { %1897 = vmatmul.msk.f32.vlgmr.msra.gmra.mxu3 %vm407_vm13, %v1650_v47 }
 0x8bc   :  { %v1639_v36 = vpop.xlane.xlu1 %1638 }
 0x8bd   :  { %2016 = vrcp.f32 %v1639_v36 }
 0x8c1   :  { %v1674_v18 = vpop.f32.mrf.mxu3 }
 0x8c3   :  { %v2017_v56 = vpop.eup %2016 }
 0x8c4   :  { %v1649_v58 = vmul.f32 %v2017_v56, %v2009_v35  ;;  %v1636_v12 = vpop.xlane.xlu0 %1635 }
 0x8c5   :  { %2018 = vrcp.f32 %v1636_v12 }
 0x8c6   :  { %1896 = vmatmul.msk.f32.vlgmr.msrb.gmra.mxu2 %vm407_vm13, %v1649_v58 }
 0x8cb   :  { %v2019_v59 = vpop.eup %2018 }
 0x8cc   :  { %v1648_v60 = vmul.f32 %v2019_v59, %v2011_v38 }
 0x8d4   :  { %v1678_v41 = vpop.permute.xlu1 %1677 }
 0x8d5   :  { %1698 = vmatpush.msrb.mxu0 %v1678_v41 }
 0x8d6   :  { %v1007_v3 = vpop.f32.mrf.mxu1  ;;  %1895 = vmatmul.msk.f32.vlgmr.msrb.gmra.mxu0 %vm407_vm13, %v1648_v60 }
 0x8d7   :  { %1862 = vmatmul.msk.f32.vlgmr.msrb.gmra.mxu1 %vm407_vm13, %v1007_v3  ;;  %1782 = vmatpush.msra.mxu0 %v552_v5 }
 0x8de   :  { %1898 = vmatmul.msk.f32.vlgmr.msra.gmra.mxu0 %vm407_vm13, %v1674_v18 }
 0x8df   :  { %1863 = vmatmul.msk.f32.gmra.mxu1 %vm407_vm13, %v2739_v27 }
 0x8e7   :  { %1864 = vmatmul.msk.f32.gmra.mxu1 %vm407_vm13, %v2692_v25 }
 0x8ef   :  { %1865 = vmatmul.msk.f32.gmra.mxu1 %vm407_vm13, %v2685_v6 }
 0x8f7   :  { %1882 = vmatmul.msk.f32.vlgmr.msra.gmra.mxu1 %vm407_vm13, %v2766_v24 }
 0x8ff   :  { %1883 = vmatmul.msk.f32.gmra.mxu1 %vm407_vm13, %v2762_v49 }
 0x907   :  { %1884 = vmatmul.msk.f32.gmra.mxu1 %vm407_vm13, %v2770_v61 }
 0x90f   :  { %1885 = vmatmul.msk.f32.gmra.mxu1 %vm407_vm13, %v2764_v54  ;;  %v1947_v54 = vld [vmem:[%s2834_s6] ss:$0 sm:$0xff]  ;;  %s2244_s6 = smov [#allocation14]  }
 0x910   :  { %s1816_s11 = sshll.u32 %s2244_s6, 4  ;;  %s1817_s11 = int_to_ptr.vmem [resolvable:$true] %s1816_s11 }
 0x939   :  { %v1752_v27 = vpop.f32.mrf.mxu3 }
 0x949   :  { %v1726_v40 = vpop.f32.mrf.mxu2 }
 0x94a   :  { %1900 = vmatmul.msk.f32.vlgmr.msra.gmra.mxu2 %vm407_vm13, %v1726_v40 }
 0x952   :  { %1901 = vmatmul.msk.f32.gmra.mxu2 %vm407_vm13, %v1752_v27 }
 0x953   :  { %v1700_v25 = vpop.f32.mrf.mxu0 }
 0x954   :  { %v1117_v6 = vpop.f32.mrf.mxu1  ;;  %1899 = vmatmul.msk.f32.gmra.mxu0 %vm407_vm13, %v1700_v25 }
 0x955   :  { %v1159_v49 = vadd.f32 %v2743_v28, %v1117_v6 }
 0x95b   :  { %v1784_v4 = vpop.f32.mrf.mxu0 }
 0x95c   :  { %v1120_v24 = vpop.f32.mrf.mxu1 }
 0x95d   :  { %v1162_v63 = vadd.f32 %v2745_v31, %v1120_v24 }
 0x964   :  { %v1123_v2 = vpop.f32.mrf.mxu1 }
 0x965   :  { %v1165_v8 = vadd.f32 %v2748_v30, %v1123_v2 }
 0x96c   :  { %v1126_v13 = vpop.f32.mrf.mxu1 }
 0x96d   :  { %v1168_v22 = vadd.f32 %v2752_v39, %v1126_v13 }
 0x974   :  { %v1469_v55 = vpop.f32.mrf.mxu1 }
 0x975   :  { %v1481_v61 = vadd.f32 %v1469_v55, %v1159_v49 }
 0x977   :  { %v1796_v20 = vadd.f32 %v1784_v4, %v1481_v61 }
 0x979   :  { %v1804_v16 = vadd.f32 %v1947_v54, %v1796_v20 }
 0x97b   :  { %1808 = vst.msk [vmem:[#allocation14] sm:$0xff] %vm142_vm0, %v1804_v16 }
 0x97c   :  { %v1472_v10 = vpop.f32.mrf.mxu1 }
 0x97d   :  { %v1482_v17 = vadd.f32 %v1472_v10, %v1162_v63 }
 0x984   :  { %v1475_v7 = vpop.f32.mrf.mxu1 }
 0x985   :  { %v1483_v11 = vadd.f32 %v1475_v7, %v1165_v8 }
 0x98c   :  { %v1478_v0 = vpop.f32.mrf.mxu1 }
 0x98d   :  { %v1484_v26 = vadd.f32 %v1478_v0, %v1168_v22 }
 0x9cd   :  { %v1790_v15 = vpop.f32.mrf.mxu2 }
 0x9ce   :  { %v1798_v28 = vadd.f32 %v1790_v15, %v1483_v11 }
 0x9d0   :  { %v1806_v9 = vadd.f32 %v1947_v54, %v1798_v28 }
 0x9d1   :  { %v1787_v51 = vpop.f32.mrf.mxu0 }
 0x9d2   :  { %1810 = vst.msk [vmem:[#allocation14 + $0x10] sm:$0xff] %vm142_vm0, %v1806_v9  ;;  %v1797_v23 = vadd.f32 %v1787_v51, %v1482_v17 }
 0x9d4   :  { %v1805_v62 = vadd.f32 %v1947_v54, %v1797_v23 }
 0x9d5   :  { %v1793_v19 = vpop.f32.mrf.mxu2 }
 0x9d6   :  { %1809 = vst.msk [vmem:[#allocation14 + $0x8] sm:$0xff] %vm142_vm0, %v1805_v62  ;;  %v1799_v31 = vadd.f32 %v1793_v19, %v1484_v26 }
 0x9d8   :  { %v1807_v30 = vadd.f32 %v1947_v54, %v1799_v31 }
 0x9da   :  { %1811 = vst.msk [vmem:[#allocation14 + $0x18] sm:$0xff] %vm142_vm0, %v1807_v30 }
 0x9db   :  { %1824 = dma.vmem_to_hbm [thread:$0]  %s1817_s11, 512, %s1819_s14, [#allocation4], %s2224_s1, %s2224_s1, %s2225_s22  }
 0x9dc   :  { %2220 = dma.done.wait [#allocation4], 512  }
 0x9dd   :  { %2221 = vsyncadd [#allocation4], 4294966784 }
 0x9de   :  { %1829 = vsyncpa [#allocation3], 1 }
 0x9df   :  { %1830 = vsyncpa [#allocation6], 1 }
 0x9e0   :  { %1831 = vsyncpa [#allocation9], 1 }
 0x9e1   :  { %1832 = vsyncpa [#allocation12], 1 }
 0x9e2   :  { %1833 = vsyncpa [#allocation4], 1 }

</bundles_post_ra>
